<compile_context>
chip_gen: v7x
topology: tpu7x:2x2x1
jax: 0.10.0
libtpu: 0.0.40
codegen_flags: <defaults>
</compile_context>

<pallas_src>
import math
import functools

import jax
import jax.numpy as jnp
from jax import lax
from jax.experimental import pallas as pl
from jax.experimental.pallas import tpu as pltpu


def _erf_f32(x):
    # float32 erf via the Eigen/XLA rational polynomial (matches torch.erf to
    # ~1 ulp); built from mul/add/clamp + EUP reciprocal so it lowers on Mosaic.
    x = jnp.clip(x, -4.0, 4.0)
    x2 = x * x
    a = jnp.float32(-2.72614225801306e-10)
    a = a * x2 + jnp.float32(2.77068142495902e-08)
    a = a * x2 + jnp.float32(-2.10102402082508e-06)
    a = a * x2 + jnp.float32(-5.69250639462346e-05)
    a = a * x2 + jnp.float32(-7.34990630326855e-04)
    a = a * x2 + jnp.float32(-2.95459980854025e-03)
    a = a * x2 + jnp.float32(-1.60960333262415e-02)
    a = a * x
    b = jnp.float32(-1.45660718464996e-05)
    b = b * x2 + jnp.float32(-2.13374055278905e-04)
    b = b * x2 + jnp.float32(-1.68282697438203e-03)
    b = b * x2 + jnp.float32(-7.37332916720468e-03)
    b = b * x2 + jnp.float32(-1.42647390514189e-02)
    # a / b via EUP reciprocal + one Newton refinement (keeps ~f32 accuracy,
    # moves the divide off the VPU slot).
    inv_b = pl.reciprocal(b, approx=True)
    inv_b = inv_b * (jnp.float32(2.0) - b * inv_b)
    return a * inv_b


def _gelu_exact(x):
    # nn.GELU() default (exact / erf formulation), kept for PyTorch parity.
    return 0.5 * x * (1.0 + _erf_f32(x * jnp.float32(0.7071067811865476)))


def _layernorm(x, g, b, eps=1e-5):
    # PyTorch LayerNorm: biased variance, eps inside sqrt (f32 math).
    mu = jnp.mean(x, axis=-1, keepdims=True)
    var = jnp.mean(jnp.square(x - mu), axis=-1, keepdims=True)
    return (x - mu) * lax.rsqrt(var + eps) * g + b


def _tblock_kernel(num_heads, causal, *refs):
    if causal:
        (x_ref, padm_ref,
         ln1_g, ln1_b, wqkv, bqkv, out_w,
         ln2_g, ln2_b, w1, b1, w2, b2, o_ref) = refs
        casm_ref = None
    else:
        (x_ref, padm_ref, casm_ref,
         ln1_g, ln1_b, wqkv, bqkv, out_w,
         ln2_g, ln2_b, w1, b1, w2, b2, o_ref) = refs

    x = x_ref[0].astype(jnp.float32)                # [S, F]
    S, F = x.shape
    H = num_heads
    dh = F // H

    # ---- LN1 + fused (q/k/v Linear ∘ MHA in_proj) projection: one GEMM ----
    h = _layernorm(x, ln1_g[...], ln1_b[...])
    qkv = jnp.dot(h.astype(jnp.bfloat16), wqkv[...],
                  preferred_element_type=jnp.float32) + bqkv[...]   # [S, 3F] f32
    qkv_bf = qkv.astype(jnp.bfloat16)               # single lane-dense cast

    # head-batched views [H, S, dh]; q already carries the 1/sqrt(dh) scale
    q = jnp.transpose(qkv_bf[:, 0 * F:1 * F].reshape(S, H, dh), (1, 0, 2))
    k = jnp.transpose(qkv_bf[:, 1 * F:2 * F].reshape(S, H, dh), (1, 0, 2))
    v = jnp.transpose(qkv_bf[:, 2 * F:3 * F].reshape(S, H, dh), (1, 0, 2))

    # ---- additive attention mask [S, S]: causal (iota) or explicit int8 ----
    if causal:
        row = lax.broadcasted_iota(jnp.int32, (S, S), 0)
        col = lax.broadcasted_iota(jnp.int32, (S, S), 1)
        cas_add = jnp.where(col <= row, jnp.float32(0.0), jnp.float32(-1e30))
    else:
        cas_add = casm_ref[...].astype(jnp.float32) * jnp.float32(-1e30)
    mask = cas_add + padm_ref[0]                     # [S,S] + [1,S] key padding

    # ---- attention: single batched dot_general over the head axis ----
    s = jnp.einsum('hqd,hkd->hqk', q, k,
                   preferred_element_type=jnp.float32)              # [H, S, S]
    s = s + mask[None, :, :]
    s = s - jnp.max(s, axis=-1, keepdims=True)
    p = jnp.exp(s)
    l = jnp.sum(p, axis=-1, keepdims=True)                          # [H, S, 1]
    o = jnp.einsum('hqk,hkd->hqd', p.astype(jnp.bfloat16), v,
                   preferred_element_type=jnp.float32)              # [H, S, dh]
    # normalize AFTER the PV GEMM: (p/l) @ v == (p @ v) / l, far fewer elements
    o = o * pl.reciprocal(l, approx=True)
    attn = jnp.transpose(o, (1, 0, 2)).reshape(S, F)                # [S, F]

    attn_out = jnp.dot(attn.astype(jnp.bfloat16), out_w[...],
                       preferred_element_type=jnp.float32)          # [S, F]

    # ---- residual 1, LN2, MLP (GELU), residual 2 ----
    h = attn_out + x
    h = _layernorm(h, ln2_g[...], ln2_b[...])
    res = h
    m = jnp.dot(h.astype(jnp.bfloat16), w1[...],
                preferred_element_type=jnp.float32) + b1[...]
    m = _gelu_exact(m)
    m = jnp.dot(m.astype(jnp.bfloat16), w2[...],
                preferred_element_type=jnp.float32) + b2[...]
    o_ref[0] = (m + res).astype(o_ref.dtype)


def init_params(key, attn_dim, mlp_dim):
    F, M = attn_dim, mlp_dim
    ks = jax.random.split(key, 12)
    s = 0.05
    return {
        "ln1_g": jnp.ones((F,), jnp.float32),
        "ln1_b": jnp.zeros((F,), jnp.float32),
        "wq": s * jax.random.normal(ks[0], (F, F), jnp.float32),
        "bq": s * jax.random.normal(ks[1], (F,), jnp.float32),
        "wk": s * jax.random.normal(ks[2], (F, F), jnp.float32),
        "bk": s * jax.random.normal(ks[3], (F,), jnp.float32),
        "wv": s * jax.random.normal(ks[4], (F, F), jnp.float32),
        "bv": s * jax.random.normal(ks[5], (F,), jnp.float32),
        "in_proj_w": s * jax.random.normal(ks[6], (3 * F, F), jnp.float32),
        "out_proj_w": s * jax.random.normal(ks[7], (F, F), jnp.float32),
        "ln2_g": jnp.ones((F,), jnp.float32),
        "ln2_b": jnp.zeros((F,), jnp.float32),
        "w1": s * jax.random.normal(ks[8], (M, F), jnp.float32),
        "b1": s * jax.random.normal(ks[9], (M,), jnp.float32),
        "w2": s * jax.random.normal(ks[10], (F, M), jnp.float32),
        "b2": s * jax.random.normal(ks[11], (F,), jnp.float32),
    }


def prepare_tblock_params(params, num_heads):
    """One-time weight folding (off the per-call path).

    Folds q/k/v Linear into the MHA in_proj (and the 1/sqrt(dh) scale into the
    q slice):  q' = (h @ Wq^T + bq) @ Winq^T  ==  h @ (Wq^T Winq^T) + bq Winq^T
    Returns a tuple of kernel-ready (bf16 matmul weights, f32 LN/bias) arrays.
    """
    F = params["wq"].shape[0]
    dh = F // num_heads
    scale = jnp.float32(1.0 / math.sqrt(dh))
    ipw = params["in_proj_w"]                       # [3F, F], PyTorch layout
    winq, wink, winv = ipw[:F], ipw[F:2 * F], ipw[2 * F:]
    wq_eff = (params["wq"].T @ winq.T) * scale
    bq_eff = (params["bq"] @ winq.T) * scale
    wk_eff = params["wk"].T @ wink.T
    bk_eff = params["bk"] @ wink.T
    wv_eff = params["wv"].T @ winv.T
    bv_eff = params["bv"] @ winv.T
    wqkv = jnp.concatenate([wq_eff, wk_eff, wv_eff], axis=1).astype(jnp.bfloat16)
    bqkv = jnp.concatenate([bq_eff, bk_eff, bv_eff]).reshape(1, 3 * F)
    r2 = lambda a: a.reshape(1, -1).astype(jnp.float32)   # 1-D params -> [1, N]
    return (
        r2(params["ln1_g"]), r2(params["ln1_b"]),
        wqkv,                                           # [F, 3F] bf16
        bqkv.astype(jnp.float32),                       # [1, 3F] f32
        params["out_proj_w"].T.astype(jnp.bfloat16),    # [F, F]  bf16
        r2(params["ln2_g"]), r2(params["ln2_b"]),
        params["w1"].T.astype(jnp.bfloat16), r2(params["b1"]),
        params["w2"].T.astype(jnp.bfloat16), r2(params["b2"]),
    )


@functools.lru_cache(maxsize=1)
def _vmem_limit_bytes():
    # budget ~60% of physical VMEM (v5e/v6e 128 MiB -> ~76 MiB, v7x 64 MiB -> ~38 MiB)
    try:
        cap = getattr(pltpu.get_tpu_info(), "vmem_capacity_bytes", None)
        if cap:
            return int(cap) * 3 // 5
    except Exception:
        pass
    return 40 * 1024 * 1024


@functools.partial(jax.jit, static_argnames=("num_heads", "assume_causal"))
def tblock_forward(x, pad_attn_mask, cas_attn_mask, packed, num_heads,
                   assume_causal=False):
    """x: [B,S,F]; pad_attn_mask: [B,S] bool (True=pad); cas_attn_mask: [S,S] bool.

    `packed` is the output of prepare_tblock_params() (weight folding hoisted
    out of the per-call path)."""
    B, S, F = x.shape
    M = packed[7].shape[1]
    dh = F // num_heads
    NEG = jnp.float32(-1e30)
    padm = jnp.where(pad_attn_mask, NEG, jnp.float32(0.0)) \
              .astype(jnp.float32).reshape(B, 1, S)

    args = [x, padm]                                 # x at native dtype (cast in-kernel)
    in_specs = [
        pl.BlockSpec((1, S, F), lambda b: (b, 0, 0)),   # x: one batch row / step
        pl.BlockSpec((1, 1, S), lambda b: (b, 0, 0)),   # pad mask row
    ]
    # weights / constant operands: whole-array resident in VMEM (single copy,
    # no per-grid-step double-buffering)
    resident = pl.BlockSpec(memory_space=pltpu.MemorySpace.VMEM)
    if not assume_causal:
        # general path: arbitrary attn mask shipped as int8 0/1, expanded in-kernel
        args.append(cas_attn_mask.astype(jnp.int8))
        in_specs.append(resident)
    args += list(packed)
    in_specs += [resident] * len(packed)

    # advisory cost estimate so XLA schedules / overlaps around the kernel
    flops = int(B * (2 * S * (3 * F * F + F * F + 2 * F * M)
                     + 4 * num_heads * S * S * dh))
    transcendentals = int(B * (num_heads * S * S + S * M))
    bytes_accessed = int(sum(a.size * a.dtype.itemsize for a in args)
                         + B * S * F * x.dtype.itemsize)

    return pl.pallas_call(
        functools.partial(_tblock_kernel, num_heads, assume_causal),
        out_shape=jax.ShapeDtypeStruct((B, S, F), x.dtype),
        grid=(B,),
        in_specs=in_specs,
        out_specs=pl.BlockSpec((1, S, F), lambda b: (b, 0, 0)),
        compiler_params=pltpu.CompilerParams(
            # batch steps are independent -> megacore-shardable
            dimension_semantics=("parallel",),
            vmem_limit_bytes=_vmem_limit_bytes(),
        ),
        cost_estimate=pl.CostEstimate(flops=flops,
                                      transcendentals=transcendentals,
                                      bytes_accessed=bytes_accessed),
    )(*args)


if __name__ == "__main__":
    # lane-dense demo shapes: F and MLP are multiples of 128
    B, S, F, H, MLP = 2, 8, 128, 4, 256
    key = jax.random.PRNGKey(0)
    kx, kp = jax.random.split(key)

    x = jax.random.normal(kx, (B, S, F), jnp.float32)
    # key padding: last two positions of batch element 1 are padding
    pad = jnp.zeros((B, S), jnp.bool_).at[1, -2:].set(True)
    # causal mask: True above the diagonal = disallowed
    cas = jnp.triu(jnp.ones((S, S), jnp.bool_), k=1)

    params = init_params(kp, F, MLP)
    packed = prepare_tblock_params(params, H)     # weight folding done once

    # optimized path: causal mask generated in-kernel from iota (no [S,S] DMA)
    out = tblock_forward(x, pad, cas, packed, num_heads=H, assume_causal=True)
    jax.block_until_ready(out)
    # general path: explicit int8 attn mask shipped to the kernel (module semantics)
    out_ref = tblock_forward(x, pad, cas, packed, num_heads=H,
                             assume_causal=False)
    jax.block_until_ready(out_ref)

    assert out.shape == (B, S, F)
    assert bool(jnp.all(jnp.isfinite(out)))
    assert bool(jnp.allclose(out, out_ref, atol=1e-3, rtol=1e-3))
    print("KERNEL_OK")
</pallas_src>

<mosaic_0001>
module attributes {stable_mosaic.version = 11 : i64} {
  func.func @_tblock_kernel(%arg0: i32, %arg1: memref<1x8x128xf32, #tpu.memory_space<vmem>>, %arg2: memref<1x1x8xf32, #tpu.memory_space<vmem>>, %arg3: memref<1x128xf32, #tpu.memory_space<vmem>>, %arg4: memref<1x128xf32, #tpu.memory_space<vmem>>, %arg5: memref<128x384xbf16, #tpu.memory_space<vmem>>, %arg6: memref<1x384xf32, #tpu.memory_space<vmem>>, %arg7: memref<128x128xbf16, #tpu.memory_space<vmem>>, %arg8: memref<1x128xf32, #tpu.memory_space<vmem>>, %arg9: memref<1x128xf32, #tpu.memory_space<vmem>>, %arg10: memref<128x256xbf16, #tpu.memory_space<vmem>>, %arg11: memref<1x256xf32, #tpu.memory_space<vmem>>, %arg12: memref<256x128xbf16, #tpu.memory_space<vmem>>, %arg13: memref<1x128xf32, #tpu.memory_space<vmem>>, %arg14: memref<1x8x128xf32, #tpu.memory_space<vmem>>) attributes {dimension_semantics = [#tpu.dimension_semantics<parallel>], iteration_bounds = array<i64: 2>, scalar_prefetch = 0 : i64, scratch_operands = 0 : i64, tpu.core_type = #tpu.core_type<tc>, window_params = [{transform_indices = @transform_0, window_bounds = array<i64: 1, 8, 128>}, {transform_indices = @transform_1, window_bounds = array<i64: 1, 1, 8>}, {pipeline_mode = #tpu.pipeline_mode<synchronous>, transform_indices = @transform_2, window_bounds = array<i64: 1, 128>}, {pipeline_mode = #tpu.pipeline_mode<synchronous>, transform_indices = @transform_3, window_bounds = array<i64: 1, 128>}, {pipeline_mode = #tpu.pipeline_mode<synchronous>, transform_indices = @transform_4, window_bounds = array<i64: 128, 384>}, {pipeline_mode = #tpu.pipeline_mode<synchronous>, transform_indices = @transform_5, window_bounds = array<i64: 1, 384>}, {pipeline_mode = #tpu.pipeline_mode<synchronous>, transform_indices = @transform_6, window_bounds = array<i64: 128, 128>}, {pipeline_mode = #tpu.pipeline_mode<synchronous>, transform_indices = @transform_7, window_bounds = array<i64: 1, 128>}, {pipeline_mode = #tpu.pipeline_mode<synchronous>, transform_indices = @transform_8, window_bounds = array<i64: 1, 128>}, {pipeline_mode = #tpu.pipeline_mode<synchronous>, transform_indices = @transform_9, window_bounds = array<i64: 128, 256>}, {pipeline_mode = #tpu.pipeline_mode<synchronous>, transform_indices = @transform_10, window_bounds = array<i64: 1, 256>}, {pipeline_mode = #tpu.pipeline_mode<synchronous>, transform_indices = @transform_11, window_bounds = array<i64: 256, 128>}, {pipeline_mode = #tpu.pipeline_mode<synchronous>, transform_indices = @transform_12, window_bounds = array<i64: 1, 128>}, {transform_indices = @transform_13, window_bounds = array<i64: 1, 8, 128>}]} {
    %c0 = arith.constant 0 : index
    %c0_0 = arith.constant 0 : index
    %c0_1 = arith.constant 0 : index
    %0 = vector.load %arg1[%c0, %c0_0, %c0_1] : memref<1x8x128xf32, #tpu.memory_space<vmem>>, vector<1x8x128xf32>
    %1 = vector.shape_cast %0 : vector<1x8x128xf32> to vector<8x128xf32>
    %c0_2 = arith.constant 0 : index
    %c0_3 = arith.constant 0 : index
    %2 = vector.load %arg3[%c0_2, %c0_3] : memref<1x128xf32, #tpu.memory_space<vmem>>, vector<1x128xf32>
    %c0_4 = arith.constant 0 : index
    %c0_5 = arith.constant 0 : index
    %3 = vector.load %arg4[%c0_4, %c0_5] : memref<1x128xf32, #tpu.memory_space<vmem>>, vector<1x128xf32>
    %cst = arith.constant dense<0.000000e+00> : vector<8xf32>
    %4 = vector.multi_reduction <add>, %1, %cst [1] : vector<8x128xf32> to vector<8xf32>
    %5 = vector.shape_cast %4 : vector<8xf32> to vector<8x1xf32>
    %cst_6 = arith.constant 1.280000e+02 : f32
    %6 = vector.broadcast %cst_6 : f32 to vector<8x1xf32>
    %7 = arith.divf %5, %6 : vector<8x1xf32>
    %8 = vector.broadcast %7 : vector<8x1xf32> to vector<8x128xf32>
    %9 = arith.subf %1, %8 : vector<8x128xf32>
    %10 = arith.mulf %9, %9 : vector<8x128xf32>
    %cst_7 = arith.constant dense<0.000000e+00> : vector<8xf32>
    %11 = vector.multi_reduction <add>, %10, %cst_7 [1] : vector<8x128xf32> to vector<8xf32>
    %12 = vector.shape_cast %11 : vector<8xf32> to vector<8x1xf32>
    %cst_8 = arith.constant 1.280000e+02 : f32
    %13 = vector.broadcast %cst_8 : f32 to vector<8x1xf32>
    %14 = arith.divf %12, %13 : vector<8x1xf32>
    %15 = vector.broadcast %7 : vector<8x1xf32> to vector<8x128xf32>
    %16 = arith.subf %1, %15 : vector<8x128xf32>
    %cst_9 = arith.constant 9.99999974E-6 : f32
    %17 = vector.broadcast %cst_9 : f32 to vector<8x1xf32>
    %18 = arith.addf %14, %17 : vector<8x1xf32>
    %19 = math.rsqrt %18 : vector<8x1xf32>
    %20 = vector.broadcast %19 : vector<8x1xf32> to vector<8x128xf32>
    %21 = arith.mulf %16, %20 : vector<8x128xf32>
    %22 = vector.broadcast %2 : vector<1x128xf32> to vector<8x128xf32>
    %23 = arith.mulf %21, %22 : vector<8x128xf32>
    %24 = vector.broadcast %3 : vector<1x128xf32> to vector<8x128xf32>
    %25 = arith.addf %23, %24 : vector<8x128xf32>
    %26 = arith.truncf %25 : vector<8x128xf32> to vector<8x128xbf16>
    %c0_10 = arith.constant 0 : index
    %c0_11 = arith.constant 0 : index
    %27 = vector.load %arg5[%c0_10, %c0_11] : memref<128x384xbf16, #tpu.memory_space<vmem>>, vector<128x384xbf16>
    %cst_12 = arith.constant dense<0.000000e+00> : vector<8x384xf32>
    %28 = tpu.matmul %26, %27, %cst_12 {dimension_numbers = #tpu.dot_dimension_numbers<[1], [0], [0], [1], [0, 0, 1, 1], [], []>} : vector<8x128xbf16>, vector<128x384xbf16>, vector<8x384xf32> -> vector<8x384xf32>
    %c0_13 = arith.constant 0 : index
    %c0_14 = arith.constant 0 : index
    %29 = vector.load %arg6[%c0_13, %c0_14] : memref<1x384xf32, #tpu.memory_space<vmem>>, vector<1x384xf32>
    %30 = vector.broadcast %29 : vector<1x384xf32> to vector<8x384xf32>
    %31 = arith.addf %28, %30 : vector<8x384xf32>
    %32 = arith.truncf %31 : vector<8x384xf32> to vector<8x384xbf16>
    %33 = vector.extract_strided_slice %32 {offsets = [0, 0], sizes = [8, 128], strides = [1, 1]} : vector<8x384xbf16> to vector<8x128xbf16>
    %34 = vector.shape_cast %33 : vector<8x128xbf16> to vector<8x4x32xbf16>
    %35 = tpu.transpose %34, [1, 0, 2] : vector<8x4x32xbf16> -> vector<4x8x32xbf16>
    %36 = vector.extract_strided_slice %32 {offsets = [0, 128], sizes = [8, 128], strides = [1, 1]} : vector<8x384xbf16> to vector<8x128xbf16>
    %37 = vector.shape_cast %36 : vector<8x128xbf16> to vector<8x4x32xbf16>
    %38 = tpu.transpose %37, [1, 0, 2] : vector<8x4x32xbf16> -> vector<4x8x32xbf16>
    %39 = vector.extract_strided_slice %32 {offsets = [0, 256], sizes = [8, 128], strides = [1, 1]} : vector<8x384xbf16> to vector<8x128xbf16>
    %40 = vector.shape_cast %39 : vector<8x128xbf16> to vector<8x4x32xbf16>
    %41 = tpu.transpose %40, [1, 0, 2] : vector<8x4x32xbf16> -> vector<4x8x32xbf16>
    %42 = tpu.iota {dimensions = array<i32: 0>} : vector<8x8xi32>
    %43 = tpu.iota {dimensions = array<i32: 1>} : vector<8x8xi32>
    %44 = arith.cmpi sle, %43, %42 : vector<8x8xi32>
    %cst_15 = arith.constant 0.000000e+00 : f32
    %cst_16 = arith.constant -1.000000e+30 : f32
    %45 = vector.broadcast %cst_15 : f32 to vector<8x8xf32>
    %46 = vector.broadcast %cst_16 : f32 to vector<8x8xf32>
    %47 = arith.select %44, %45, %46 : vector<8x8xi1>, vector<8x8xf32>
    %c0_17 = arith.constant 0 : index
    %c0_18 = arith.constant 0 : index
    %c0_19 = arith.constant 0 : index
    %48 = vector.load %arg2[%c0_17, %c0_18, %c0_19] : memref<1x1x8xf32, #tpu.memory_space<vmem>>, vector<1x1x8xf32>
    %49 = vector.shape_cast %48 : vector<1x1x8xf32> to vector<1x8xf32>
    %50 = vector.broadcast %49 : vector<1x8xf32> to vector<8x8xf32>
    %51 = arith.addf %47, %50 : vector<8x8xf32>
    "tpu.trace_start"() <{level = 10 : i32, message = "hqd,hkd->hqk"}> : () -> ()
    %cst_20 = arith.constant dense<0.000000e+00> : vector<4x8x8xf32>
    %52 = tpu.matmul %35, %38, %cst_20 {dimension_numbers = #tpu.dot_dimension_numbers<[2], [2], [1], [1], [0, 0, 0, 1, 1, 1], [0], [0]>} : vector<4x8x32xbf16>, vector<4x8x32xbf16>, vector<4x8x8xf32> -> vector<4x8x8xf32>
    "tpu.trace_stop"() : () -> ()
    %53 = vector.shape_cast %51 : vector<8x8xf32> to vector<1x8x8xf32>
    %54 = vector.broadcast %53 : vector<1x8x8xf32> to vector<4x8x8xf32>
    %55 = arith.addf %52, %54 : vector<4x8x8xf32>
    %cst_21 = arith.constant dense<0xFF800000> : vector<4x8xf32>
    %56 = vector.multi_reduction <maximumf>, %55, %cst_21 [2] : vector<4x8x8xf32> to vector<4x8xf32>
    %57 = vector.shape_cast %56 : vector<4x8xf32> to vector<4x8x1xf32>
    %58 = vector.broadcast %57 : vector<4x8x1xf32> to vector<4x8x8xf32>
    %59 = arith.subf %55, %58 : vector<4x8x8xf32>
    %60 = math.exp %59 : vector<4x8x8xf32>
    %cst_22 = arith.constant dense<0.000000e+00> : vector<4x8xf32>
    %61 = vector.multi_reduction <add>, %60, %cst_22 [2] : vector<4x8x8xf32> to vector<4x8xf32>
    %62 = vector.shape_cast %61 : vector<4x8xf32> to vector<4x8x1xf32>
    %63 = arith.truncf %60 : vector<4x8x8xf32> to vector<4x8x8xbf16>
    "tpu.trace_start"() <{level = 10 : i32, message = "hqk,hkd->hqd"}> : () -> ()
    %cst_23 = arith.constant dense<0.000000e+00> : vector<4x8x32xf32>
    %64 = tpu.matmul %63, %41, %cst_23 {dimension_numbers = #tpu.dot_dimension_numbers<[2], [1], [1], [2], [0, 0, 0, 1, 1, 2], [0], [0]>} : vector<4x8x8xbf16>, vector<4x8x32xbf16>, vector<4x8x32xf32> -> vector<4x8x32xf32>
    "tpu.trace_stop"() : () -> ()
    %65 = tpu.reciprocal %62 {approx = true} : vector<4x8x1xf32> -> vector<4x8x1xf32>
    %66 = vector.broadcast %65 : vector<4x8x1xf32> to vector<4x8x32xf32>
    %67 = arith.mulf %64, %66 : vector<4x8x32xf32>
    %68 = tpu.transpose %67, [1, 0, 2] : vector<4x8x32xf32> -> vector<8x4x32xf32>
    %69 = vector.shape_cast %68 : vector<8x4x32xf32> to vector<8x128xf32>
    %70 = arith.truncf %69 : vector<8x128xf32> to vector<8x128xbf16>
    %c0_24 = arith.constant 0 : index
    %c0_25 = arith.constant 0 : index
    %71 = vector.load %arg7[%c0_24, %c0_25] : memref<128x128xbf16, #tpu.memory_space<vmem>>, vector<128x128xbf16>
    %cst_26 = arith.constant dense<0.000000e+00> : vector<8x128xf32>
    %72 = tpu.matmul %70, %71, %cst_26 {dimension_numbers = #tpu.dot_dimension_numbers<[1], [0], [0], [1], [0, 0, 1, 1], [], []>} : vector<8x128xbf16>, vector<128x128xbf16>, vector<8x128xf32> -> vector<8x128xf32>
    %73 = arith.addf %72, %1 : vector<8x128xf32>
    %c0_27 = arith.constant 0 : index
    %c0_28 = arith.constant 0 : index
    %74 = vector.load %arg8[%c0_27, %c0_28] : memref<1x128xf32, #tpu.memory_space<vmem>>, vector<1x128xf32>
    %c0_29 = arith.constant 0 : index
    %c0_30 = arith.constant 0 : index
    %75 = vector.load %arg9[%c0_29, %c0_30] : memref<1x128xf32, #tpu.memory_space<vmem>>, vector<1x128xf32>
    %cst_31 = arith.constant dense<0.000000e+00> : vector<8xf32>
    %76 = vector.multi_reduction <add>, %73, %cst_31 [1] : vector<8x128xf32> to vector<8xf32>
    %77 = vector.shape_cast %76 : vector<8xf32> to vector<8x1xf32>
    %cst_32 = arith.constant 1.280000e+02 : f32
    %78 = vector.broadcast %cst_32 : f32 to vector<8x1xf32>
    %79 = arith.divf %77, %78 : vector<8x1xf32>
    %80 = vector.broadcast %79 : vector<8x1xf32> to vector<8x128xf32>
    %81 = arith.subf %73, %80 : vector<8x128xf32>
    %82 = arith.mulf %81, %81 : vector<8x128xf32>
    %cst_33 = arith.constant dense<0.000000e+00> : vector<8xf32>
    %83 = vector.multi_reduction <add>, %82, %cst_33 [1] : vector<8x128xf32> to vector<8xf32>
    %84 = vector.shape_cast %83 : vector<8xf32> to vector<8x1xf32>
    %cst_34 = arith.constant 1.280000e+02 : f32
    %85 = vector.broadcast %cst_34 : f32 to vector<8x1xf32>
    %86 = arith.divf %84, %85 : vector<8x1xf32>
    %87 = vector.broadcast %79 : vector<8x1xf32> to vector<8x128xf32>
    %88 = arith.subf %73, %87 : vector<8x128xf32>
    %cst_35 = arith.constant 9.99999974E-6 : f32
    %89 = vector.broadcast %cst_35 : f32 to vector<8x1xf32>
    %90 = arith.addf %86, %89 : vector<8x1xf32>
    %91 = math.rsqrt %90 : vector<8x1xf32>
    %92 = vector.broadcast %91 : vector<8x1xf32> to vector<8x128xf32>
    %93 = arith.mulf %88, %92 : vector<8x128xf32>
    %94 = vector.broadcast %74 : vector<1x128xf32> to vector<8x128xf32>
    %95 = arith.mulf %93, %94 : vector<8x128xf32>
    %96 = vector.broadcast %75 : vector<1x128xf32> to vector<8x128xf32>
    %97 = arith.addf %95, %96 : vector<8x128xf32>
    %98 = arith.truncf %97 : vector<8x128xf32> to vector<8x128xbf16>
    %c0_36 = arith.constant 0 : index
    %c0_37 = arith.constant 0 : index
    %99 = vector.load %arg10[%c0_36, %c0_37] : memref<128x256xbf16, #tpu.memory_space<vmem>>, vector<128x256xbf16>
    %cst_38 = arith.constant dense<0.000000e+00> : vector<8x256xf32>
    %100 = tpu.matmul %98, %99, %cst_38 {dimension_numbers = #tpu.dot_dimension_numbers<[1], [0], [0], [1], [0, 0, 1, 1], [], []>} : vector<8x128xbf16>, vector<128x256xbf16>, vector<8x256xf32> -> vector<8x256xf32>
    %c0_39 = arith.constant 0 : index
    %c0_40 = arith.constant 0 : index
    %101 = vector.load %arg11[%c0_39, %c0_40] : memref<1x256xf32, #tpu.memory_space<vmem>>, vector<1x256xf32>
    %102 = vector.broadcast %101 : vector<1x256xf32> to vector<8x256xf32>
    %103 = arith.addf %100, %102 : vector<8x256xf32>
    %cst_41 = arith.constant 5.000000e-01 : f32
    %104 = vector.broadcast %cst_41 : f32 to vector<8x256xf32>
    %105 = arith.mulf %104, %103 : vector<8x256xf32>
    %cst_42 = arith.constant 0.707106769 : f32
    %106 = vector.broadcast %cst_42 : f32 to vector<8x256xf32>
    %107 = arith.mulf %103, %106 : vector<8x256xf32>
    %cst_43 = arith.constant -4.000000e+00 : f32
    %cst_44 = arith.constant 4.000000e+00 : f32
    %108 = vector.broadcast %cst_43 : f32 to vector<8x256xf32>
    %109 = arith.maximumf %108, %107 : vector<8x256xf32>
    %110 = vector.broadcast %cst_44 : f32 to vector<8x256xf32>
    %111 = arith.minimumf %110, %109 : vector<8x256xf32>
    %112 = arith.mulf %111, %111 : vector<8x256xf32>
    %cst_45 = arith.constant -2.72614237E-10 : f32
    %113 = vector.broadcast %cst_45 : f32 to vector<8x256xf32>
    %114 = arith.mulf %113, %112 : vector<8x256xf32>
    %cst_46 = arith.constant 2.77068146E-8 : f32
    %115 = vector.broadcast %cst_46 : f32 to vector<8x256xf32>
    %116 = arith.addf %114, %115 : vector<8x256xf32>
    %117 = arith.mulf %116, %112 : vector<8x256xf32>
    %cst_47 = arith.constant -2.10102394E-6 : f32
    %118 = vector.broadcast %cst_47 : f32 to vector<8x256xf32>
    %119 = arith.addf %117, %118 : vector<8x256xf32>
    %120 = arith.mulf %119, %112 : vector<8x256xf32>
    %cst_48 = arith.constant -5.69250624E-5 : f32
    %121 = vector.broadcast %cst_48 : f32 to vector<8x256xf32>
    %122 = arith.addf %120, %121 : vector<8x256xf32>
    %123 = arith.mulf %122, %112 : vector<8x256xf32>
    %cst_49 = arith.constant -7.34990637E-4 : f32
    %124 = vector.broadcast %cst_49 : f32 to vector<8x256xf32>
    %125 = arith.addf %123, %124 : vector<8x256xf32>
    %126 = arith.mulf %125, %112 : vector<8x256xf32>
    %cst_50 = arith.constant -2.954600e-03 : f32
    %127 = vector.broadcast %cst_50 : f32 to vector<8x256xf32>
    %128 = arith.addf %126, %127 : vector<8x256xf32>
    %129 = arith.mulf %128, %112 : vector<8x256xf32>
    %cst_51 = arith.constant -0.0160960332 : f32
    %130 = vector.broadcast %cst_51 : f32 to vector<8x256xf32>
    %131 = arith.addf %129, %130 : vector<8x256xf32>
    %132 = arith.mulf %131, %111 : vector<8x256xf32>
    %cst_52 = arith.constant -1.45660715E-5 : f32
    %133 = vector.broadcast %cst_52 : f32 to vector<8x256xf32>
    %134 = arith.mulf %133, %112 : vector<8x256xf32>
    %cst_53 = arith.constant -2.13374049E-4 : f32
    %135 = vector.broadcast %cst_53 : f32 to vector<8x256xf32>
    %136 = arith.addf %134, %135 : vector<8x256xf32>
    %137 = arith.mulf %136, %112 : vector<8x256xf32>
    %cst_54 = arith.constant -0.00168282702 : f32
    %138 = vector.broadcast %cst_54 : f32 to vector<8x256xf32>
    %139 = arith.addf %137, %138 : vector<8x256xf32>
    %140 = arith.mulf %139, %112 : vector<8x256xf32>
    %cst_55 = arith.constant -0.00737332925 : f32
    %141 = vector.broadcast %cst_55 : f32 to vector<8x256xf32>
    %142 = arith.addf %140, %141 : vector<8x256xf32>
    %143 = arith.mulf %142, %112 : vector<8x256xf32>
    %cst_56 = arith.constant -0.0142647391 : f32
    %144 = vector.broadcast %cst_56 : f32 to vector<8x256xf32>
    %145 = arith.addf %143, %144 : vector<8x256xf32>
    %146 = tpu.reciprocal %145 {approx = true} : vector<8x256xf32> -> vector<8x256xf32>
    %147 = arith.mulf %145, %146 : vector<8x256xf32>
    %cst_57 = arith.constant 2.000000e+00 : f32
    %148 = vector.broadcast %cst_57 : f32 to vector<8x256xf32>
    %149 = arith.subf %148, %147 : vector<8x256xf32>
    %150 = arith.mulf %146, %149 : vector<8x256xf32>
    %151 = arith.mulf %132, %150 : vector<8x256xf32>
    %cst_58 = arith.constant 1.000000e+00 : f32
    %152 = vector.broadcast %cst_58 : f32 to vector<8x256xf32>
    %153 = arith.addf %152, %151 : vector<8x256xf32>
    %154 = arith.mulf %105, %153 : vector<8x256xf32>
    %155 = arith.truncf %154 : vector<8x256xf32> to vector<8x256xbf16>
    %c0_59 = arith.constant 0 : index
    %c0_60 = arith.constant 0 : index
    %156 = vector.load %arg12[%c0_59, %c0_60] : memref<256x128xbf16, #tpu.memory_space<vmem>>, vector<256x128xbf16>
    %cst_61 = arith.constant dense<0.000000e+00> : vector<8x128xf32>
    %157 = tpu.matmul %155, %156, %cst_61 {dimension_numbers = #tpu.dot_dimension_numbers<[1], [0], [0], [1], [0, 0, 1, 1], [], []>} : vector<8x256xbf16>, vector<256x128xbf16>, vector<8x128xf32> -> vector<8x128xf32>
    %c0_62 = arith.constant 0 : index
    %c0_63 = arith.constant 0 : index
    %158 = vector.load %arg13[%c0_62, %c0_63] : memref<1x128xf32, #tpu.memory_space<vmem>>, vector<1x128xf32>
    %159 = vector.broadcast %158 : vector<1x128xf32> to vector<8x128xf32>
    %160 = arith.addf %157, %159 : vector<8x128xf32>
    %161 = arith.addf %160, %97 : vector<8x128xf32>
    %c0_64 = arith.constant 0 : index
    %c0_65 = arith.constant 0 : index
    %c0_66 = arith.constant 0 : index
    %162 = vector.load %arg14[%c0_64, %c0_65, %c0_66] : memref<1x8x128xf32, #tpu.memory_space<vmem>>, vector<1x8x128xf32>
    %163 = vector.shape_cast %162 : vector<1x8x128xf32> to vector<8x128xf32>
    %164 = vector.shape_cast %161 : vector<8x128xf32> to vector<1x8x128xf32>
    tpu.vector_store %arg14[%c0_64, %c0_65, %c0_66], %164 {strides = array<i32>} : memref<1x8x128xf32, #tpu.memory_space<vmem>>, vector<1x8x128xf32>,
    return
  }
  func.func @transform_0(%arg0: i32) -> (i32, i32, i32) {
    %c0_i32 = arith.constant 0 : i32
    %c0_i32_0 = arith.constant 0 : i32
    %c0_i32_1 = arith.constant 0 : i32
    return %arg0, %c0_i32, %c0_i32_0 : i32, i32, i32
  }
  func.func @transform_1(%arg0: i32) -> (i32, i32, i32) {
    %c0_i32 = arith.constant 0 : i32
    %c0_i32_0 = arith.constant 0 : i32
    %c0_i32_1 = arith.constant 0 : i32
    return %arg0, %c0_i32, %c0_i32_0 : i32, i32, i32
  }
  func.func @transform_2(%arg0: i32) -> (i32, i32) {
    %c0_i32 = arith.constant 0 : i32
    %c0_i32_0 = arith.constant 0 : i32
    %c0_i32_1 = arith.constant 0 : i32
    return %c0_i32, %c0_i32_0 : i32, i32
  }
  func.func @transform_3(%arg0: i32) -> (i32, i32) {
    %c0_i32 = arith.constant 0 : i32
    %c0_i32_0 = arith.constant 0 : i32
    %c0_i32_1 = arith.constant 0 : i32
    return %c0_i32, %c0_i32_0 : i32, i32
  }
  func.func @transform_4(%arg0: i32) -> (i32, i32) {
    %c0_i32 = arith.constant 0 : i32
    %c0_i32_0 = arith.constant 0 : i32
    %c0_i32_1 = arith.constant 0 : i32
    return %c0_i32, %c0_i32_0 : i32, i32
  }
  func.func @transform_5(%arg0: i32) -> (i32, i32) {
    %c0_i32 = arith.constant 0 : i32
    %c0_i32_0 = arith.constant 0 : i32
    %c0_i32_1 = arith.constant 0 : i32
    return %c0_i32, %c0_i32_0 : i32, i32
  }
  func.func @transform_6(%arg0: i32) -> (i32, i32) {
    %c0_i32 = arith.constant 0 : i32
    %c0_i32_0 = arith.constant 0 : i32
    %c0_i32_1 = arith.constant 0 : i32
    return %c0_i32, %c0_i32_0 : i32, i32
  }
  func.func @transform_7(%arg0: i32) -> (i32, i32) {
    %c0_i32 = arith.constant 0 : i32
    %c0_i32_0 = arith.constant 0 : i32
    %c0_i32_1 = arith.constant 0 : i32
    return %c0_i32, %c0_i32_0 : i32, i32
  }
  func.func @transform_8(%arg0: i32) -> (i32, i32) {
    %c0_i32 = arith.constant 0 : i32
    %c0_i32_0 = arith.constant 0 : i32
    %c0_i32_1 = arith.constant 0 : i32
    return %c0_i32, %c0_i32_0 : i32, i32
  }
  func.func @transform_9(%arg0: i32) -> (i32, i32) {
    %c0_i32 = arith.constant 0 : i32
    %c0_i32_0 = arith.constant 0 : i32
    %c0_i32_1 = arith.constant 0 : i32
    return %c0_i32, %c0_i32_0 : i32, i32
  }
  func.func @transform_10(%arg0: i32) -> (i32, i32) {
    %c0_i32 = arith.constant 0 : i32
    %c0_i32_0 = arith.constant 0 : i32
    %c0_i32_1 = arith.constant 0 : i32
    return %c0_i32, %c0_i32_0 : i32, i32
  }
  func.func @transform_11(%arg0: i32) -> (i32, i32) {
    %c0_i32 = arith.constant 0 : i32
    %c0_i32_0 = arith.constant 0 : i32
    %c0_i32_1 = arith.constant 0 : i32
    return %c0_i32, %c0_i32_0 : i32, i32
  }
  func.func @transform_12(%arg0: i32) -> (i32, i32) {
    %c0_i32 = arith.constant 0 : i32
    %c0_i32_0 = arith.constant 0 : i32
    %c0_i32_1 = arith.constant 0 : i32
    return %c0_i32, %c0_i32_0 : i32, i32
  }
  func.func @transform_13(%arg0: i32) -> (i32, i32, i32) {
    %c0_i32 = arith.constant 0 : i32
    %c0_i32_0 = arith.constant 0 : i32
    %c0_i32_1 = arith.constant 0 : i32
    return %arg0, %c0_i32, %c0_i32_0 : i32, i32, i32
  }
}

</mosaic_0001>

<bundles_post_ra>
// kernel: tblock_forward.1
= control target key start
LH: loop header
LB: loop body
LE: loop exit
PB: predicated region body
PF: predicated region fallthrough
CT: control target
= control target key end

     0   :  { %s3848_s0 = inlined_call_operand.hbm [shape: f32[2,8,128], index: 0, kind: input, shape index: {}]   ;;  %s3849_s1 = inlined_call_operand.vmem [shape: f32[2,1,8], index: 1, kind: input, shape index: {}]   ;;  %s3850_s2 = inlined_call_operand.vmem [shape: f32[1,128], index: 2, kind: input, shape index: {}]   ;;  %s3851_s3 = inlined_call_operand.vmem [shape: f32[1,128], index: 3, kind: input, shape index: {}]   ;;  %s3852_s4 = inlined_call_operand.hbm [shape: bf16[128,384], index: 4, kind: input, shape index: {}]   ;;  %s3853_s5 = inlined_call_operand.vmem [shape: f32[1,384], index: 5, kind: input, shape index: {}]   ;;  %s3854_s6 = inlined_call_operand.hbm [shape: bf16[128,128], index: 6, kind: input, shape index: {}]   ;;  %s3855_s7 = inlined_call_operand.vmem [shape: f32[1,128], index: 7, kind: input, shape index: {}]   ;;  %s3856_s8 = inlined_call_operand.vmem [shape: f32[1,128], index: 8, kind: input, shape index: {}]   ;;  %s3857_s9 = inlined_call_operand.hbm [shape: bf16[128,256], index: 9, kind: input, shape index: {}]   ;;  %s3858_s10 = inlined_call_operand.vmem [shape: f32[1,256], index: 10, kind: input, shape index: {}]   ;;  %s3859_s11 = inlined_call_operand.hbm [shape: bf16[256,128], index: 11, kind: input, shape index: {}]   ;;  %s3860_s12 = inlined_call_operand.vmem [shape: f32[1,128], index: 12, kind: input, shape index: {}]   ;;  %s3861_s13 = inlined_call_operand.hbm [shape: f32[2,8,128], index: 13, kind: output, shape index: {}]  }
   0x1   :  { %3866 = sst [smem:[#allocation16_spill]] %s3852_s4 }
   0x2   :  { %3867 = sst [smem:[#allocation17_spill]] %s3855_s7 }
   0x3   :  { %3868 = sst [smem:[#allocation18_spill]] %s3856_s8 }
   0x4   :  { %3869 = sst [smem:[#allocation19_spill]] %s3858_s10 }
   0x5   :  { %3870 = sst [smem:[#allocation20_spill]] %s3860_s12 }
   0x6   :  { %3871 = sst [smem:[#allocation21_spill]] %s3861_s13 }
   0x7   :  { %18 = vsyncpa [#allocation3], 0 }
   0x8   :  { %20 = vsyncpa [#allocation3 + $0x1], 0 }
   0x9   :  { %21 = vsyncpa [#allocation6], 0 }
   0xa   :  { %22 = vsyncpa [#allocation9], 0 }
   0xb   :  { %23 = vsyncpa [#allocation4], 0 }
   0xc   :  { %25 = vsyncpa [#allocation4 + $0x1], 0  ;;  %s3330_s25 = smov 0   ;;  %s3332_s26 = smov 0  }
   0xd   :  { %s3334_s27 = smov 0   ;;  %s3336_s28 = smov 0  }
   0xe LB: > { %s3239_s29 = smov [#allocation5]   ;;  %s3351_s14 = sadd.s32 4294967295, %s3237_s28   ;;  %s3237_s28 = sphi %s3336_s28, %s3898_s28   ;;  %s3233_s27 = sphi %s3334_s27, %s3897_s27   ;;  %s3229_s26 = sphi %s3332_s26, %s3896_s26   ;;  %s3225_s25 = sphi %s3330_s25, %s3895_s25  }
   0xf   : > { %s363_s30 = sshll.u32 %s3239_s29, 4  ;;  %p2569_p0 = scmp.ge.s32.totalorder %s3237_s28, 1  ;;  %s3356_s30 = int_to_ptr.vmem [resolvable:$true] %s363_s30 }
  0x10   : > { %p3863_p1 = scmp.eq.s32.totalorder %s3351_s14, 0  ;;  %p345_p2 = scmp.lt.s32.totalorder %s3237_s28, 3 }
  0x11   : > { %s3240_s16 = smov [#allocation8]   ;;  %s3241_s19 = smov [#allocation7]  }
  0x12   : > { %p3358_p3 = pnand %p2569_p0, %p345_p2  ;;  %s398_s17 = sshll.u32 %s3240_s16, 4  ;;  %s3371_s17 = int_to_ptr.vmem [resolvable:$true] %s398_s17 }
  0x13   : > { %s3373_s20 = sshll.u32 %s3241_s19, 4  ;;  %s3874_s4 = sld [smem:[#allocation16_spill]]  ;;  %s380_s20 = int_to_ptr.vmem [resolvable:$true] %s3373_s20 }
  0x14   : > { %s3872_s15 = scalar_select %p3358_p3, 1, 0 }
  0x15   : > { %p2834_p5 = pneg %p3358_p3 }
  0x17   : > { %p3367_p6 = pnand %p2834_p5, %p3863_p1 }
  0x19   : > { %s3021_s23 = scalar_lea.hbm %s3874_s4, 3072  ;;  %p3383_p8 = pneg %p3367_p6 }
  0x1a   : > { %p3022_p7 = scmp.ne.s32.totalorder %s3874_s4, %s3021_s23  ;;  %p3028_p11 = scmp.lt.u32.totalorder %s3021_s23, %s3874_s4 }
  0x1c   : > { %p3024_p9 = pnand %p3383_p8, %p3022_p7 }
  0x1e   : > { %p3025_p10 = pneg %p3024_p9 }
  0x20   : > { %p3030_p12 = pnand %p3028_p11, %p3025_p10 }
  0x22   : > { %3033 = shalt.err (!%p3030_p12)
}
  0x23   : > { %s3034_s21 = scalar_lea.vmem %s3356_s30, 3072  ;;  %p3042_p5 = scmp.lt.s32.totalorder %s3356_s30, %s3356_s30 }
  0x24   : > { %p3035_p13 = scmp.ne.s32.totalorder %s3356_s30, %s3034_s21  ;;  %p3043_p4 = scmp.lt.s32.totalorder %s3034_s21, %s3034_s21 }
  0x26   : > { %p3037_p0 = pnand %p3035_p13, %p3383_p8  ;;  %p3044_p7 = por %p3043_p4, %p3042_p5 }
  0x28   : > { %p3038_p2 = pneg %p3037_p0 }
  0x2a   : > { %p3045_p9 = pnand %p3044_p7, %p3038_p2 }
  0x2c   : > { %3048 = shalt.err (!%p3045_p9)
}
  0x2d   : > { %s3242_s22 = smov 192   ;;  %s3243_s13 = smov 12  }
  0x2e   : > { %2837 = dma.hbm_to_vmem [thread:$0]  (!%p3367_p6), %s3874_s4, 3072, %s3356_s30, [#allocation6], %s3242_s22, %s3242_s22, %s3243_s13  }
  0x2f   : > { %s3049_s12 = scalar_lea.hbm %s3857_s9, 2048 }
  0x30   : > { %p3050_p4 = scmp.ne.s32.totalorder %s3857_s9, %s3049_s12  ;;  %p3056_p12 = scmp.lt.u32.totalorder %s3049_s12, %s3857_s9 }
  0x32   : > { %p3052_p10 = pnand %p3050_p4, %p3383_p8 }
  0x34   : > { %p3053_p11 = pneg %p3052_p10 }
  0x36   : > { %p3058_p13 = pnand %p3056_p12, %p3053_p11 }
  0x38   : > { %3061 = shalt.err (!%p3058_p13)
}
  0x39   : > { %s3062_s30 = scalar_lea.vmem %s3371_s17, 2048  ;;  %p3070_p7 = scmp.lt.s32.totalorder %s3371_s17, %s3371_s17 }
  0x3a   : > { %p3063_p0 = scmp.ne.s32.totalorder %s3371_s17, %s3062_s30  ;;  %p3071_p9 = scmp.lt.s32.totalorder %s3062_s30, %s3062_s30 }
  0x3c   : > { %p3065_p2 = pnand %p3063_p0, %p3383_p8  ;;  %p3072_p4 = por %p3071_p9, %p3070_p7 }
  0x3e   : > { %p3066_p5 = pneg %p3065_p2 }
  0x40   : > { %p3073_p10 = pnand %p3072_p4, %p3066_p5 }
  0x42   : > { %3076 = shalt.err (!%p3073_p10)
}
  0x43   : > { %s3244_s8 = smov 128   ;;  %s3245_s7 = smov 8  }
  0x44   : > { %2843 = dma.hbm_to_vmem [thread:$0]  (!%p3367_p6), %s3857_s9, 2048, %s3371_s17, [#allocation9], %s3244_s8, %s3244_s8, %s3245_s7  }
  0x45   : > { %s3077_s23 = scalar_lea.hbm %s3854_s6, 1024 }
  0x46   : > { %p3078_p11 = scmp.ne.s32.totalorder %s3854_s6, %s3077_s23  ;;  %p3084_p0 = scmp.lt.u32.totalorder %s3077_s23, %s3854_s6 }
  0x48   : > { %p3080_p12 = pnand %p3078_p11, %p3383_p8 }
  0x4a   : > { %p3081_p13 = pneg %p3080_p12 }
  0x4c   : > { %p3086_p2 = pnand %p3084_p0, %p3081_p13 }
  0x4e   : > { %3089 = shalt.err (!%p3086_p2)
}
  0x4f   : > { %s3090_s30 = scalar_lea.vmem %s380_s20, 1024  ;;  %p3098_p4 = scmp.lt.s32.totalorder %s380_s20, %s380_s20 }
  0x50   : > { %p3091_p5 = scmp.ne.s32.totalorder %s380_s20, %s3090_s30  ;;  %p3099_p10 = scmp.lt.s32.totalorder %s3090_s30, %s3090_s30 }
  0x52   : > { %p3093_p7 = pnand %p3091_p5, %p3383_p8  ;;  %p3100_p1 = por %p3099_p10, %p3098_p4 }
  0x54   : > { %p3094_p9 = pneg %p3093_p7 }
  0x56   : > { %p3101_p3 = pnand %p3100_p1, %p3094_p9 }
  0x58   : > { %3104 = shalt.err (!%p3101_p3)
}
  0x59   : > { %s3246_s17 = smov 64   ;;  %s3247_s8 = smov 4  }
  0x5a   : > { %2840 = dma.hbm_to_vmem [thread:$0]  (!%p3367_p6), %s3854_s6, 1024, %s380_s20, [#allocation6], %s3246_s17, %s3246_s17, %s3247_s8  }
  0x5b   : > { %s3248_s12 = smov [#allocation10]   ;;  %s3105_s24 = scalar_lea.hbm %s3859_s11, 2048 }
  0x5c   : > { %s414_s22 = sshll.u32 %s3248_s12, 4  ;;  %p3106_p1 = scmp.ne.s32.totalorder %s3859_s11, %s3105_s24  ;;  %s415_s22 = int_to_ptr.vmem [resolvable:$true] %s414_s22 }
  0x5d   : > { %p3112_p12 = scmp.lt.u32.totalorder %s3105_s24, %s3859_s11 }
  0x5e   : > { %p3108_p3 = pnand %p3106_p1, %p3383_p8 }
  0x60   : > { %p3109_p11 = pneg %p3108_p3 }
  0x62   : > { %p3114_p13 = pnand %p3112_p12, %p3109_p11 }
  0x64   : > { %3117 = shalt.err (!%p3114_p13)
}
  0x65   : > { %s3118_s20 = scalar_lea.vmem %s415_s22, 2048  ;;  %p3126_p7 = scmp.lt.s32.totalorder %s415_s22, %s415_s22 }
  0x66   : > { %p3119_p0 = scmp.ne.s32.totalorder %s415_s22, %s3118_s20  ;;  %p3127_p9 = scmp.lt.s32.totalorder %s3118_s20, %s3118_s20 }
  0x68   : > { %p3121_p2 = pnand %p3119_p0, %p3383_p8  ;;  %p3128_p4 = por %p3127_p9, %p3126_p7 }
  0x6a   : > { %p3122_p5 = pneg %p3121_p2 }
  0x6c   : > { %p3129_p10 = pnand %p3128_p4, %p3122_p5 }
  0x6e   : > { %3132 = shalt.err (!%p3129_p10)
}
  0x6f   : > { %2846 = dma.hbm_to_vmem [thread:$0]  (!%p3367_p6), %s3859_s11, 2048, %s415_s22, [#allocation9], %s3246_s17, %s3246_s17, %s3247_s8  }
  0x70   : > { %s2568_s16 = sadd.s32 4294967294, %s3237_s28   ;;  %s3466_s18 = sadd.s32 1, %s3237_s28  }
  0x71   : > { %s35_s12 = ssub.s32 %s3237_s28, %s3466_s18  ;;  %s38_s13 = sadd.s32 1, %s3233_s27 }
  0x72   : > { %p36_p8 = scmp.eq.s32.totalorder %s35_s12, 0  ;;  %p45_p1 = scmp.ne.s32.totalorder %s3233_s27, %s3229_s26 }
  0x73   : > { %p46_p3 = scmp.eq.s32.totalorder %s3237_s28, 0  ;;  %p51_p11 = scmp.ne.s32.totalorder %s3229_s26, %s3225_s25 }
  0x74   : > { %s3477_s23 = scalar_select %p36_p8, %s3233_s27, %s38_s13  }
  0x75   : > { %p3479_p12 = por %p46_p3, %p45_p1  ;;  %p3877_p13 = scmp.eq.s32.totalorder %s3351_s14, 0 }
  0x76   : > { %p332_p0 = scmp.eq.s32.totalorder %s3351_s14, 1  ;;  %p338_p2 = scmp.eq.s32.totalorder %s2568_s16, 1 }
  0x77   : > { %p3485_p6 = por %p3877_p13, %p51_p11  ;;  %p2859_p5 = scmp.lt.s32.totalorder %s3237_s28, 2 }
  0x78   : > { %s431_s8 = sand.u32 1, %s3233_s27   ;;  %p3492_p7 = por %p332_p0, %p45_p1 }
  0x79   : > { %p3496_p9 = por %p338_p2, %p51_p11  ;;  %s2575_s19 = sshll.u32 %s431_s8, 3 }
  0x7a   : > { %s3879_s22 = scalar_select %p3492_p7, 1, 0 }
  0x7b   : > { %s3880_s29 = scalar_select %p3496_p9, 1, 0 }
  0x7c   : > { %s2576_s21 = sshll.u32 %s3237_s28, 7  ;;  %s435_s10 = scalar_lea.vmem [#allocation2], %s2575_s19 }
  0x7d   : > { %s3504_s7 = scalar_lea.hbm %s3848_s0, %s2576_s21  ;;  %s442_s16 = sshll.u32 %s435_s10, 4  ;;  %s3506_s16 = int_to_ptr.vmem [resolvable:$true] %s442_s16 }
  0x7e   : > { %p3510_p4 = pnand %p2859_p5, %p3479_p12  ;;  %s432_s13 = scalar_lea.sflag [#allocation3], %s431_s8 }
  0x7f   : > { %s3133_s4 = scalar_lea.hbm %s3504_s7, 128  ;;  %s3138_s30 = scalar_lea.hbm %s3848_s0, 256 }
  0x80   : > { %p3134_p10 = scmp.ne.s32.totalorder %s3504_s7, %s3133_s4  ;;  %p3135_p8 = pneg %p3510_p4 }
  0x81   : > { %p3139_p11 = scmp.lt.u32.totalorder %s3504_s7, %s3848_s0  ;;  %p3140_p12 = scmp.lt.u32.totalorder %s3138_s30, %s3133_s4 }
  0x82   : > { %p3136_p1 = pnand %p3135_p8, %p3134_p10  ;;  %p3142_p0 = scmp.lt.u32.totalorder %s3133_s4, %s3504_s7 }
  0x83   : > { %p3141_p13 = por %p3140_p12, %p3139_p11 }
  0x84   : > { %p3137_p3 = pneg %p3136_p1 }
  0x85   : > { %p3143_p2 = por %p3142_p0, %p3141_p13 }
  0x87   : > { %p3144_p5 = pnand %p3143_p2, %p3137_p3 }
  0x89   : > { %3147 = shalt.err (!%p3144_p5)
}
  0x8a   : > { %s3148_s8 = scalar_lea.vmem %s3506_s16, 128  ;;  %s3249_s10 = smov [#allocation2]  }
  0x8b   : > { %p3149_p10 = scmp.ne.s32.totalorder %s3506_s16, %s3148_s8  ;;  %s3153_s19 = sshll.u32 %s3249_s10, 4  ;;  %s3154_s19 = int_to_ptr.vmem [resolvable:$false] %s3153_s19 }
  0x8c   : > { %s3155_s21 = scalar_lea.vmem %s3154_s19, 256  ;;  %p3156_p7 = scmp.lt.s32.totalorder %s3506_s16, %s3154_s19 }
  0x8d   : > { %p3151_p1 = pnand %p3149_p10, %p3135_p8  ;;  %p3157_p11 = scmp.lt.s32.totalorder %s3155_s21, %s3148_s8 }
  0x8f   : > { %p3152_p9 = pneg %p3151_p1  ;;  %p3158_p12 = por %p3157_p11, %p3156_p7 }
  0x91   : > { %p3159_p13 = pnand %p3158_p12, %p3152_p9 }
  0x93   : > { %3162 = shalt.err (!%p3159_p13)
}
  0x94   : > { %2850 = dma.hbm_to_vmem [thread:$0]  (!%p3510_p4), %s3504_s7, 128, %s3506_s16, %s432_s13  }
  0x95   : > { %p3882_p3 = scmp.ne.s32.totalorder %s3872_s15, 0 }
  0x96   : > { %s3542_s4 = sand.u32 (!%p3882_p3), 1, %s3229_s26  }
  0x97   : > { %457 = sbr.rel (%p3882_p3) target bundleno = 2662 (0xa66), region = 72  ;;  %s2578_s30 = sshll.u32 (!%p3882_p3), %s3542_s4, 3 }
  0x98   : > { %s460_s24 = scalar_lea.sflag (!%p3882_p3), [#allocation3], %s3542_s4  ;;  %s3548_s20 = scalar_lea.vmem (!%p3882_p3), [#allocation2], %s2578_s30 }
  0x9e   : > { %3208 = dma.done.wait (%p3485_p6), %s460_s24, 128  }
  0x9f   : > { %3210 = vsyncadd (%p3485_p6), %s460_s24, 4294967168  ;;  %p3883_p7 = scmp.eq.s32.totalorder %s3351_s14, 0 }
  0xa1   : > { %3212 = dma.done.wait (%p3883_p7), [#allocation6], 4096   ;;  %p3884_p9 = pmov %p3883_p7 }
  0xa2   : > { %p3885_p4 = pmov %p3883_p7 }
  0xa3   : > { %3214 = vsyncadd (%p3884_p9), [#allocation6], 4294963200 }
  0xa4   : > { %3216 = dma.done.wait (%p3885_p4), [#allocation9], 4096   ;;  %p3886_p8 = pmov %p3885_p4 }
  0xa5   : > { %v529_v0 = vld [vmem:[%s3548_s20] sm:$0xff]  ;;  %v2918_v2 = vld [vmem:[#allocation5] ss:$12 sps:$4 sm:$0xff]   ;;  %v3250_v3 = vmov 0.0   ;;  %v3251_v25 = vmov 0   ;;  %vm3252_vm0 = vmmov 0   ;;  %v593_v41 = vlaneseq }
  0xa6   : > { %3218 = vsyncadd (%p3886_p8), [#allocation9], 4294963200  ;;  %532 = vadd.xlane.f32.xlu0 %v529_v0  ;;  %v2916_v1 = vld [vmem:[#allocation5 + $0x4] ss:$12 sps:$4 sm:$0xff]   ;;  %2726 = vmatprep.subr.bf16.mxu1 %v3250_v3  ;;  %v2919_v4 = vld [vmem:[#allocation5 + $0x8] ss:$12 sps:$4 sm:$0xff]  }
  0xa7   : > { %v2920_v5 = vld [vmem:[#allocation5 + $0x1c] ss:$12 sps:$4 sm:$0xff]   ;;  %v2922_v6 = vld [vmem:[#allocation5 + $0x18] ss:$12 sps:$4 sm:$0xff]   ;;  %736 = vmatprep.subr.bf16.mxu0 %v2916_v1  ;;  %v2923_v7 = vld [vmem:[#allocation5 + $0x20] ss:$12 sps:$4 sm:$0xff]   ;;  %2727 = vmatpush3.bf16.msra.mxu1 %v2919_v4 }
  0xa8   : > { %v2924_v8 = vld [vmem:[#allocation5 + $0x34] ss:$12 sps:$4 sm:$0xff]   ;;  %737 = vmatpush1.bf16.msra.mxu0 %v2918_v2  ;;  %2728 = vmatprep.subr.bf16.mxu1 %v3250_v3  ;;  %v2926_v13 = vld [vmem:[#allocation5 + $0x30] ss:$12 sps:$4 sm:$0xff]   ;;  %v2927_v14 = vld [vmem:[#allocation5 + $0x38] ss:$12 sps:$4 sm:$0xff]  }
  0xa9   : > { %738 = vmatprep.subr.bf16.mxu0 %v2920_v5  ;;  %v2928_v15 = vld [vmem:[#allocation5 + $0x4c] ss:$12 sps:$4 sm:$0xff]   ;;  %v2930_v16 = vld [vmem:[#allocation5 + $0x48] ss:$12 sps:$4 sm:$0xff]   ;;  %v2931_v17 = vld [vmem:[#allocation5 + $0x50] ss:$12 sps:$4 sm:$0xff]   ;;  %768 = vmatprep.mubr.bf16.mxu0 %v3251_v25 }
  0xaa   : > { %v2932_v18 = vld [vmem:[#allocation5 + $0x64] ss:$12 sps:$4 sm:$0xff]   ;;  %v2934_v19 = vld [vmem:[#allocation5 + $0x60] ss:$12 sps:$4 sm:$0xff]   ;;  %v2935_v20 = vld [vmem:[#allocation5 + $0x68] ss:$12 sps:$4 sm:$0xff]   ;;  %2742 = vmatprep.mubr.msk.bf16.mxu1 %vm3252_vm0, %v3250_v3 }
  0xab   : > { %2729 = vmatpush3.bf16.msra.mxu1 %v2923_v7  ;;  %v2936_v21 = vld [vmem:[#allocation5 + $0x7c] ss:$12 sps:$4 sm:$0xff]   ;;  %v2938_v22 = vld [vmem:[#allocation5 + $0x78] ss:$12 sps:$4 sm:$0xff]   ;;  %v2939_v23 = vld [vmem:[#allocation5 + $0x80] ss:$12 sps:$4 sm:$0xff]  }
  0xac   : > { %739 = vmatpush1.bf16.msra.mxu0 %v2922_v6  ;;  %2730 = vmatprep.subr.bf16.mxu1 %v3250_v3  ;;  %v2940_v24 = vld [vmem:[#allocation5 + $0x94] ss:$12 sps:$4 sm:$0xff]   ;;  %v2942_v26 = vld [vmem:[#allocation5 + $0x90] ss:$12 sps:$4 sm:$0xff]   ;;  %v2943_v27 = vld [vmem:[#allocation5 + $0x98] ss:$12 sps:$4 sm:$0xff]  }
  0xad   : > { %740 = vmatprep.subr.bf16.mxu0 %v2924_v8  ;;  %v2944_v28 = vld [vmem:[#allocation5 + $0xac] ss:$12 sps:$4 sm:$0xff]   ;;  %v2946_v29 = vld [vmem:[#allocation5 + $0xa8] ss:$12 sps:$4 sm:$0xff]   ;;  %v2947_v30 = vld [vmem:[#allocation5 + $0xb0] ss:$12 sps:$4 sm:$0xff]  }
  0xae   : > { %v2584_v35 = vld [vmem:[%s3850_s2] ss:$0 sm:$0xff]  ;;  %v3587_v42 = vshrl.u32 %v593_v41, 7  ;;  %s3253_s8 = smov 32   ;;  %s3254_s10 = smov 96   ;;  %vm1338_vm1 = vcmask 261120  }
  0xaf   : > { %2731 = vmatpush3.bf16.msra.mxu1 %v2927_v14  ;;  %v2585_v37 = vld [vmem:[%s3851_s3] ss:$0 sm:$0xff]  ;;  %s3255_s19 = smov 64   ;;  %v3257_v2 = vmov 1934713408   ;;  %p525_p6 = scmp.lt.s32.totalorder %s3351_s14, 1 }
  0xb0   : > { %741 = vmatpush1.bf16.msra.mxu0 %v2926_v13  ;;  %2732 = vmatprep.subr.bf16.mxu1 %v3250_v3  ;;  %v599_v43 = vsub.s32 1, %v3587_v42  ;;  %v591_v44 = vld [vmem:[%s3853_s5] sm:$0x7]  ;;  %v595_v46 = vsub.s32 0, %v3587_v42  ;;  %v603_v60 = vsub.s32 2, %v3587_v42  ;;  %v845_v4 = vunpack.c.l.s4 %v3257_v2  ;;  %s3887_s16 = sld [smem:[#allocation17_spill]] }
  0xb1   : > { %742 = vmatprep.subr.bf16.mxu0 %v2928_v15  ;;  %s526_s21 = scalar_select %p525_p6, %s3351_s14, 1  ;;  %vm1523_vm3 = vcmask 64512   ;;  %vm1567_vm4 = vcmask 1043456   ;;  %vm1906_vm5 = vcmask 523264   ;;  %vm1908_vm6 = vcmask 785408  }
  0xb2   : > { %v600_v45 = vrot.slane %v591_v44, %v599_v43  ;;  %v596_v56 = vrot.slane %v591_v44, %v595_v46  ;;  %v604_v61 = vrot.slane %v591_v44, %v603_v60  ;;  %v846_v6 = vunpack.c.0.s8 %v845_v4  ;;  %s524_s7 = scalar_lea.vmem [#allocation11], %s2578_s30  ;;  %p3892_p2 = scmp.ne.s32.totalorder %s3879_s22, 0 }
  0xb3   : > { %2733 = vmatpush3.bf16.msra.mxu1 %v2931_v17  ;;  %s527_s17 = scalar_lea.vmem %s3849_s1, %s526_s21  ;;  %s3889_s21 = sld [smem:[#allocation19_spill]] }
  0xb4   : > { %743 = vmatpush1.bf16.msra.mxu0 %v2930_v16  ;;  %2734 = vmatprep.subr.bf16.mxu1 %v3250_v3 }
  0xb5   : > { %744 = vmatprep.subr.bf16.mxu0 %v2932_v18 }
  0xb7   : > { %2735 = vmatpush3.bf16.msra.mxu1 %v2935_v20 }
  0xb8   : > { %745 = vmatpush1.bf16.msra.mxu0 %v2934_v19  ;;  %2736 = vmatprep.subr.bf16.mxu1 %v3250_v3 }
  0xb9   : > { %746 = vmatprep.subr.bf16.mxu0 %v2936_v21 }
  0xbb   : > { %2737 = vmatpush3.bf16.msra.mxu1 %v2939_v23 }
  0xbc   : > { %747 = vmatpush1.bf16.msra.mxu0 %v2938_v22  ;;  %2738 = vmatprep.subr.bf16.mxu1 %v3250_v3 }
  0xbd   : > { %748 = vmatprep.subr.bf16.mxu0 %v2940_v24 }
  0xbf   : > { %2739 = vmatpush3.bf16.msra.mxu1 %v2943_v27 }
  0xc0   : > { %749 = vmatpush1.bf16.msra.mxu0 %v2942_v26  ;;  %2740 = vmatprep.subr.bf16.mxu1 %v3250_v3 }
  0xc1   : > { %750 = vmatprep.subr.bf16.mxu0 %v2944_v28 }
  0xc3   : > { %2741 = vmatpush3.bf16.msra.mxu1 %v2947_v30 }
  0xc4   : > { %751 = vmatpush1.bf16.msra.mxu0 %v2946_v29  ;;  %2746 = vmatprep.subr.bf16.mxu1 %v3250_v3 }
  0xc5   : > { %2770 = vmatprep.subr.bf16.mxu0 %v3250_v3 }
 0x133   : > { %v533_v9 = vpop.xlane.xlu0 %532 }
 0x134   : > { %v535_v10 = vmul.f32 0.0078125, %v533_v9 }
 0x136   : > { %v536_v11 = vsub.f32 %v529_v0, %v535_v10  ;;  %v3256_v0 = vmov 1983009808   ;;  %v3613_v10 = vsub.s32 %v846_v6, %v3587_v42 }
 0x137   : > { %v828_v1 = vunpack.c.l.s4 %v3256_v0 }
 0x138   : > { %v537_v12 = vmul.f32 %v536_v11, %v536_v11 }
 0x139   : > { %v829_v5 = vunpack.c.0.s8 %v828_v1 }
 0x13a   : > { %538 = vadd.xlane.f32.xlu0 %v537_v12 }
 0x13b   : > { %v3610_v7 = vsub.s32 %v829_v5, %v3587_v42 }
 0x1c7   : > { %v539_v31 = vpop.xlane.xlu0 %538 }
 0x1c8   : > { %v540_v32 = vmul.f32 0.0078125, %v539_v31 }
 0x1ca   : > { %v541_v33 = vadd.f32 1e-05, %v540_v32 }
 0x1cc   : > { %2996 = vrsqrt.f32 %v541_v33 }
 0x1d6   : > { %v2997_v34 = vpop.eup %2996 }
 0x1d7   : > { %v543_v36 = vmul.f32 %v2997_v34, %v536_v11 }
 0x1d9   : > { %v550_v38 = vmul.f32 %v2584_v35, %v543_v36 }
 0x1db   : > { %v557_v39 = vadd.f32 %v2585_v37, %v550_v38 }
 0x1dd   : > { %v558_v40 = vpack.c.bf16 %v557_v39, %v557_v39 }
 0x1df   : > { %769 = vmatmul.mubr.bf16.vlgmr.msra.gmra.mrb[0].mxu0 %v558_v40  ;;  %2743 = vmatmul.mubr.bf16.vlgmr.msra.gmra.mrb[0].mxu1 %v558_v40 }
 0x1e0   : > { %2748 = vmatprep.mubr.msk.bf16.mxu1 %vm3252_vm0, %v3250_v3  ;;  %2772 = vmatprep.mubr.msk.bf16.mxu0 %vm3252_vm0, %v3250_v3 }
 0x2b2   : > { %v770_v47 = vpop.f32.mrb[0].mxu0  ;;  %v811_v48 = vpop.f32.mrb[0].mxu1 }
 0x2b3   : > { %v772_v49 = vpop.f32.mrb[1].mxu0  ;;  %v2744_v50 = vpop.f32.mrb[1].mxu1  ;;  %v771_v58 = vadd.f32 %v770_v47, %v596_v56  ;;  %v812_v62 = vadd.f32 %v811_v48, %v604_v61 }
 0x2b4   : > { %v773_v51 = vadd.f32 %v772_v49, %v600_v45  ;;  %v774_v52 = vpop.f32.mrb[2].mxu0  ;;  %v814_v53 = vpop.f32.mrb[2].mxu1 }
 0x2b5   : > { %v775_v54 = vpop.f32.mrb[3].mxu0  ;;  %v2745_v55 = vpop.f32.mrb[3].mxu1  ;;  %v817_v59 = vpack.c.bf16 %v771_v58, %v771_v58  ;;  %v3605_v63 = vpack.c.bf16 %v812_v62, %v812_v62 }
 0x2b6   : > { %v818_v57 = vpack.c.bf16 %v773_v51, %v773_v51 }
 0x2b7   : > { %v833_v31 = vrot.slane %v817_v59, %v3610_v7 }
 0x2b8   : > { %993 = vrot.lane.b32.xlu0 %v818_v57, %s3253_s8  ;;  %989 = vrot.lane.b32.xlu1 %v818_v57, %s3254_s10  ;;  %v1001_v19 = vrot.slane %v818_v57, %v3610_v7 }
 0x2bc   : > { %991 = vrot.lane.b32.xlu1 %v818_v57, %s3255_s19 }
 0x2c0   : > { %821 = vrot.lane.b32.xlu1 %v817_v59, %s3254_s10 }
 0x2c4   : > { %823 = vrot.lane.b32.xlu1 %v817_v59, %s3255_s19 }
 0x2c8   : > { %825 = vrot.lane.b32.xlu1 %v817_v59, %s3253_s8 }
 0x2cc   : > { %1157 = vrot.lane.b32.xlu1 %v3605_v63, %s3254_s10 }
 0x32a   : > { %v994_v8 = vpop.permute.xlu0 %993  ;;  %v990_v9 = vpop.permute.xlu1 %989 }
 0x32b   : > { %v1043_v11 = vrot.slane %v994_v8, %v3610_v7  ;;  %v1035_v12 = vrot.slane %v990_v9, %v3610_v7 }
 0x32d   : > { %v1044_v13 = vcombine.low %v1035_v12, %v1043_v11  ;;  %v1045_v14 = vcombine.high %v1035_v12, %v1043_v11 }
 0x32e   : > { %v992_v15 = vpop.permute.xlu1 %991 }
 0x32f   : > { %v1052_v16 = vrot.slane %v1044_v13, %v3613_v10  ;;  %v1059_v17 = vrot.slane %v1045_v14, %v3613_v10  ;;  %v1009_v18 = vrot.slane %v992_v15, %v3610_v7 }
 0x331   : > { %v1060_v20 = vcombine.high %v1052_v16, %v3251_v25  ;;  %v1010_v21 = vcombine.low %v1001_v19, %v1009_v18  ;;  %v1011_v22 = vcombine.high %v1001_v19, %v1009_v18  ;;  %v1061_v24 = vcombine.high %v1059_v17, %v3251_v25 }
 0x332   : > { %v822_v23 = vpop.permute.xlu1 %821  ;;  %v1067_v28 = vshrl.u32 %v1052_v16, 16  ;;  %v1083_v30 = vshrl.u32 %v1059_v17, 16 }
 0x333   : > { %v1018_v26 = vrot.slane %v1010_v21, %v3613_v10  ;;  %v1025_v27 = vrot.slane %v1011_v22, %v3613_v10  ;;  %v1075_v29 = vshrl.u32 %v1060_v20, 16  ;;  %v1091_v37 = vshrl.u32 %v1061_v24, 16 }
 0x334   : > { %v867_v60 = vrot.slane %v822_v23, %v3610_v7 }
 0x335   : > { %v1026_v32 = vcombine.high %v1018_v26, %v3251_v25  ;;  %v1027_v33 = vcombine.high %v1025_v27, %v3251_v25  ;;  %v1064_v34 = vpack.i.b16 %v1052_v16, %v1018_v26  ;;  %v1066_v35 = vshrl.u32 %v1018_v26, 16 }
 0x336   : > { %v824_v36 = vpop.permute.xlu1 %823  ;;  %v1080_v38 = vpack.i.b16 %v1059_v17, %v1025_v27  ;;  %v1082_v39 = vshrl.u32 %v1025_v27, 16 }
 0x337   : > { %v841_v40 = vrot.slane %v824_v36, %v3610_v7  ;;  %v1068_v44 = vpack.i.b16 %v1067_v28, %v1066_v35  ;;  %v1072_v45 = vpack.i.b16 %v1060_v20, %v1026_v32  ;;  %v1074_v47 = vshrl.u32 %v1026_v32, 16 }
 0x338   : > { %v1088_v48 = vpack.i.b16 %v1061_v24, %v1027_v33  ;;  %v1084_v49 = vpack.i.b16 %v1083_v30, %v1082_v39  ;;  %v1090_v50 = vshrl.u32 %v1027_v33, 16  ;;  %v1094_v51 = vcombine.low %v1064_v34, %v1080_v38 }
 0x339   : > { %v842_v52 = vcombine.low %v833_v31, %v841_v40  ;;  %v1076_v53 = vpack.i.b16 %v1075_v29, %v1074_v47  ;;  %v843_v55 = vcombine.high %v833_v31, %v841_v40 }
 0x33a   : > { %v1102_v54 = vcombine.low %v1072_v45, %v1088_v48  ;;  %v826_v56 = vpop.permute.xlu1 %825  ;;  %v1092_v57 = vpack.i.b16 %v1091_v37, %v1090_v50  ;;  %v1119_v58 = vcombine.low %v1068_v44, %v1084_v49  ;;  %v1101_v1 = vrot.slane %v1094_v51, %v3610_v7 }
 0x33b   : > { %v850_v59 = vrot.slane %v842_v52, %v3613_v10  ;;  %v857_v61 = vrot.slane %v843_v55, %v3613_v10  ;;  %v875_v62 = vrot.slane %v826_v56, %v3610_v7 }
 0x33c   : > { %v1109_v0 = vrot.slane %v1102_v54, %v3610_v7  ;;  %v1127_v2 = vcombine.low %v1076_v53, %v1092_v57  ;;  %v1126_v11 = vrot.slane %v1119_v58, %v3610_v7 }
 0x33d   : > { %v858_v4 = vcombine.high %v850_v59, %v3251_v25  ;;  %v859_v5 = vcombine.high %v857_v61, %v3251_v25  ;;  %v876_v6 = vcombine.low %v867_v60, %v875_v62  ;;  %v877_v8 = vcombine.high %v867_v60, %v875_v62 }
 0x33e   : > { %v1110_v9 = vcombine.low %v1101_v1, %v1109_v0  ;;  %v1134_v12 = vrot.slane %v1127_v2, %v3610_v7  ;;  %v898_v13 = vshrl.u32 %v850_v59, 16  ;;  %v914_v17 = vshrl.u32 %v857_v61, 16 }
 0x33f   : > { %v884_v14 = vrot.slane %v876_v6, %v3613_v10  ;;  %v891_v15 = vrot.slane %v877_v8, %v3613_v10  ;;  %v906_v16 = vshrl.u32 %v858_v4, 16  ;;  %v922_v18 = vshrl.u32 %v859_v5, 16 }
 0x340   : > { %v1135_v19 = vcombine.low %v1126_v11, %v1134_v12  ;;  %v1117_v27 = vrot.slane %v1110_v9, %v3613_v10 }
 0x341   : > { %v892_v20 = vcombine.high %v884_v14, %v3251_v25  ;;  %v893_v21 = vcombine.high %v891_v15, %v3251_v25  ;;  %v896_v22 = vpack.i.b16 %v884_v14, %v850_v59  ;;  %v899_v23 = vshrl.u32 %v884_v14, 16 }
 0x342   : > { %v912_v24 = vpack.i.b16 %v891_v15, %v857_v61  ;;  %v915_v26 = vshrl.u32 %v891_v15, 16  ;;  %v1142_v28 = vrot.slane %v1135_v19, %v3613_v10  ;;  %v1147_v54 = vshrl.u32 %v1117_v27, 16 }
 0x343   : > { %v900_v29 = vpack.i.b16 %v899_v23, %v898_v13  ;;  %v904_v30 = vpack.i.b16 %v892_v20, %v858_v4  ;;  %v907_v31 = vshrl.u32 %v892_v20, 16  ;;  %v920_v32 = vpack.i.b16 %v893_v21, %v859_v5  ;;  %v2610_v20 = vld [vmem:[%s527_s17] ss:$0 sm:$0xff]  ;;  %s3890_s17 = sld [smem:[#allocation20_spill]] }
 0x344   : > { %v916_v33 = vpack.i.b16 %v915_v26, %v914_v17  ;;  %v923_v34 = vshrl.u32 %v893_v21, 16  ;;  %v926_v35 = vcombine.low %v896_v22, %v912_v24  ;;  %v1146_v36 = vpack.i.b16 %v1142_v28, %v1117_v27 }
 0x345   : > { %v908_v37 = vpack.i.b16 %v907_v31, %v906_v16  ;;  %v934_v38 = vcombine.low %v904_v30, %v920_v32  ;;  %v1148_v52 = vshrl.u32 %v1142_v28, 16  ;;  %v1143_v60 = vcombine.high %v1142_v28, %v3251_v25 }
 0x346   : > { %v924_v39 = vpack.i.b16 %v923_v34, %v922_v18  ;;  %v951_v40 = vcombine.low %v900_v29, %v916_v33  ;;  %v1343_v44 = vsel %vm1338_vm1, %v1146_v36, 0  ;;  %v933_v47 = vrot.slane %v926_v35, %v3610_v7 }
 0x347   : > { %v941_v45 = vrot.slane %v934_v38, %v3610_v7  ;;  %2747 = vmatpush3.bf16.xpose.msra.mxu1 %v1343_v44  ;;  %v1149_v57 = vpack.i.b16 %v1148_v52, %v1147_v54  ;;  %v1118_v62 = vcombine.high %v1117_v27, %v3251_v25  ;;  %v1154_v5 = vshrl.u32 %v1143_v60, 16 }
 0x348   : > { %v959_v48 = vcombine.low %v908_v37, %v924_v39  ;;  %2752 = vmatprep.subr.bf16.mxu1 %v3250_v3  ;;  %v958_v50 = vrot.slane %v951_v40, %v3610_v7  ;;  %v1327_v17 = vand.u32 127, %v593_v41  ;;  %v3258_v18 = vmov -1e+30  }
 0x349   : > { %v942_v49 = vcombine.low %v933_v47, %v941_v45  ;;  %v1389_v59 = vsel %vm1338_vm1, %v1149_v57, 0  ;;  %v1152_v1 = vpack.i.b16 %v1143_v60, %v1118_v62  ;;  %v1153_v8 = vshrl.u32 %v1118_v62, 16 }
 0x34a   : > { %v966_v51 = vrot.slane %v959_v48, %v3610_v7  ;;  %vm1328_vm2 = vcmp.le.s32.totalorder %v1327_v17, %v3587_v42 }
 0x34b   : > { %v949_v55 = vrot.slane %v942_v49, %v3613_v10  ;;  %v1435_v4 = vsel %vm1338_vm1, %v1152_v1, 0  ;;  %v1155_v11 = vpack.i.b16 %v1154_v5, %v1153_v8  ;;  %v1329_v19 = vsel %vm1328_vm2, 0.0, %v3258_v18 }
 0x34c   : > { %v967_v53 = vcombine.low %v958_v50, %v966_v51  ;;  %v1337_v21 = vadd.f32 %v2610_v20, %v1329_v19  ;;  %v1158_v50 = vpop.permute.xlu1 %1157  ;;  %v1169_v1 = vrot.slane %v3605_v63, %v3610_v7 }
 0x34d   : > { %v979_v0 = vshrl.u32 %v949_v55, 16  ;;  %v950_v9 = vcombine.high %v949_v55, %v3251_v25  ;;  %v1481_v13 = vsel %vm1338_vm1, %v1155_v11, 0 }
 0x34e   : > { %v974_v56 = vrot.slane %v967_v53, %v3613_v10 }
 0x34f   : > { %v985_v15 = vshrl.u32 %v950_v9, 16 }
 0x350   : > { %v978_v58 = vpack.i.b16 %v974_v56, %v949_v55  ;;  %v980_v61 = vshrl.u32 %v974_v56, 16  ;;  %v975_v6 = vcombine.high %v974_v56, %v3251_v25  ;;  %v1203_v56 = vrot.slane %v1158_v50, %v3610_v7 }
 0x352   : > { %2749 = vmatmul.mubr.msk.bf16.vlgmr.msra.gmra.mrb[4].mxu1 %vm1338_vm1, %v978_v58  ;;  %v981_v2 = vpack.i.b16 %v980_v61, %v979_v0  ;;  %v984_v12 = vpack.i.b16 %v975_v6, %v950_v9  ;;  %v986_v14 = vshrl.u32 %v975_v6, 16 }
 0x353   : > { %2753 = vmatpush3.bf16.xpose.msra.mxu1 %v1389_v59  ;;  %2754 = vmatprep.mubr.msk.bf16.mxu1 %vm3252_vm0, %v3250_v3 }
 0x354   : > { %2758 = vmatprep.subr.bf16.mxu1 %v3250_v3  ;;  %v987_v16 = vpack.i.b16 %v986_v14, %v985_v15 }
 0x35a   : > { %2755 = vmatmul.mubr.msk.bf16.vlgmr.msra.gmra.mrb[8].mxu1 %vm1338_vm1, %v981_v2 }
 0x35b   : > { %2759 = vmatpush3.bf16.xpose.msra.mxu1 %v1435_v4  ;;  %2760 = vmatprep.mubr.msk.bf16.mxu1 %vm3252_vm0, %v3250_v3 }
 0x35c   : > { %2764 = vmatprep.subr.bf16.mxu1 %v3250_v3 }
 0x362   : > { %2761 = vmatmul.mubr.msk.bf16.vlgmr.msra.gmra.mrb[12].mxu1 %vm1338_vm1, %v984_v12 }
 0x363   : > { %2765 = vmatpush3.bf16.xpose.msra.mxu1 %v1481_v13  ;;  %2766 = vmatprep.mubr.msk.bf16.mxu1 %vm3252_vm0, %v3250_v3 }
 0x364   : > { %2776 = vmatprep.subr.bf16.mxu1 %v3250_v3 }
 0x36a   : > { %2767 = vmatmul.mubr.msk.bf16.vlgmr.msra.gmra.mrb[16].mxu1 %vm1338_vm1, %v987_v16 }
 0x36b   : > { %2778 = vmatprep.mubr.msk.bf16.mxu1 %vm3252_vm0, %v3250_v3 }
 0x425   : > { %v1379_v22 = vpop.f32.mrb[4].mxu1 }
 0x426   : > { %v1380_v23 = vadd.f32 %v1379_v22, %v1337_v21  ;;  %v2750_v24 = vpop.f32.mrb[5].mxu1 }
 0x427   : > { %v1382_v26 = vpop.f32.mrb[6].mxu1 }
 0x428   : > { %v2751_v27 = vpop.f32.mrb[7].mxu1  ;;  %v1524_v28 = vsel %vm1523_vm3, %v1380_v23, -inf }
 0x429   : > { %1525 = vmax.xlane.f32.xlu1 %v1524_v28 }
 0x42d   : > { %v1425_v41 = vpop.f32.mrb[8].mxu1 }
 0x42e   : > { %v1426_v29 = vadd.f32 %v1425_v41, %v1337_v21  ;;  %v2756_v30 = vpop.f32.mrb[9].mxu1 }
 0x42f   : > { %v1428_v31 = vpop.f32.mrb[10].mxu1 }
 0x430   : > { %v2757_v32 = vpop.f32.mrb[11].mxu1  ;;  %v1527_v33 = vsel %vm1523_vm3, %v1426_v29, -inf }
 0x431   : > { %1528 = vmax.xlane.f32.xlu0 %v1527_v33 }
 0x435   : > { %v1471_v34 = vpop.f32.mrb[12].mxu1 }
 0x436   : > { %v2762_v35 = vpop.f32.mrb[13].mxu1  ;;  %v3688_v45 = vadd.f32 %v1471_v34, %v1337_v21 }
 0x437   : > { %v1474_v36 = vpop.f32.mrb[14].mxu1 }
 0x438   : > { %v2763_v37 = vpop.f32.mrb[15].mxu1  ;;  %v1530_v47 = vsel %vm1523_vm3, %v3688_v45, -inf }
 0x43a   : > { %1161 = vrot.lane.b32.xlu1 %v3605_v63, %s3253_s8 }
 0x43d   : > { %v1517_v38 = vpop.f32.mrb[16].mxu1 }
 0x43e   : > { %v2768_v39 = vpop.f32.mrb[17].mxu1  ;;  %v3692_v48 = vadd.f32 %v1517_v38, %v1337_v21 }
 0x43f   : > { %v1520_v40 = vpop.f32.mrb[18].mxu1 }
 0x440   : > { %v2769_v44 = vpop.f32.mrb[19].mxu1  ;;  %v1533_v49 = vsel %vm1523_vm3, %v3692_v48, -inf }
 0x447   : > { %1159 = vrot.lane.b32.xlu0 %v3605_v63, %s3255_s19 }
 0x45e   : > { %1531 = vmax.xlane.f32.xlu1 %v1530_v47 }
 0x466   : > { %1534 = vmax.xlane.f32.xlu0 %v1533_v49 }
 0x4b6   : > { %v1526_v51 = vpop.xlane.xlu1 %1525 }
 0x4b7   : > { %v1536_v52 = vsub.f32 %v1380_v23, %v1526_v51 }
 0x4b9   : > { %v1540_v53 = vmul.f32 1.442695, %v1536_v52 }
 0x4ba   : > { %v1162_v54 = vpop.permute.xlu1 %1161 }
 0x4bb   : > { %2998 = vpow2.f32 %v1540_v53  ;;  %v1211_v55 = vrot.slane %v1162_v54, %v3610_v7 }
 0x4bd   : > { %v1212_v57 = vcombine.low %v1203_v56, %v1211_v55  ;;  %v1213_v60 = vcombine.high %v1203_v56, %v1211_v55 }
 0x4be   : > { %v1529_v58 = vpop.xlane.xlu0 %1528 }
 0x4bf   : > { %v1537_v59 = vsub.f32 %v1426_v29, %v1529_v58  ;;  %v1220_v61 = vrot.slane %v1212_v57, %v3613_v10  ;;  %v1227_v4 = vrot.slane %v1213_v60, %v3613_v10 }
 0x4c1   : > { %v1542_v62 = vmul.f32 1.442695, %v1537_v59  ;;  %v1228_v9 = vcombine.high %v1220_v61, %v3251_v25  ;;  %v1229_v14 = vcombine.high %v1227_v4, %v3251_v25  ;;  %v1235_v63 = vshrl.u32 %v1220_v61, 16 }
 0x4c2   : > { %v1160_v0 = vpop.permute.xlu0 %1159  ;;  %v1251_v20 = vshrl.u32 %v1227_v4, 16 }
 0x4c3   : > { %v1177_v2 = vrot.slane %v1160_v0, %v3610_v7  ;;  %3000 = vpow2.f32 %v1542_v62  ;;  %v1243_v19 = vshrl.u32 %v1228_v9, 16  ;;  %v1259_v28 = vshrl.u32 %v1229_v14, 16 }
 0x4c5   : > { %v2999_v5 = vpop.eup %2998  ;;  %v1178_v6 = vcombine.low %v1169_v1, %v1177_v2  ;;  %v1179_v8 = vcombine.high %v1169_v1, %v1177_v2 }
 0x4c6   : > { %v1548_v11 = vsel %vm1523_vm3, %v2999_v5, 0.0  ;;  %v1560_v0 = vpack.c.bf16 %v2999_v5, %v2999_v5 }
 0x4c7   : > { %v1186_v12 = vrot.slane %v1178_v6, %v3613_v10  ;;  %v1193_v13 = vrot.slane %v1179_v8, %v3613_v10  ;;  %1549 = vadd.xlane.f32.xlu1 %v1548_v11 }
 0x4c9   : > { %v1194_v15 = vcombine.high %v1186_v12, %v3251_v25  ;;  %v1195_v16 = vcombine.high %v1193_v13, %v3251_v25  ;;  %v1232_v17 = vpack.i.b16 %v1220_v61, %v1186_v12  ;;  %v1234_v18 = vshrl.u32 %v1186_v12, 16 }
 0x4ca   : > { %v1248_v21 = vpack.i.b16 %v1227_v4, %v1193_v13  ;;  %v1250_v22 = vshrl.u32 %v1193_v13, 16 }
 0x4cb   : > { %v1236_v23 = vpack.i.b16 %v1235_v63, %v1234_v18  ;;  %v1240_v24 = vpack.i.b16 %v1228_v9, %v1194_v15  ;;  %v1242_v26 = vshrl.u32 %v1194_v15, 16  ;;  %v1256_v27 = vpack.i.b16 %v1229_v14, %v1195_v16  ;;  %v2949_v18 = vld [vmem:[#allocation7 + $0x8] sm:$0xff]  }
 0x4cc   : > { %v1252_v41 = vpack.i.b16 %v1251_v20, %v1250_v22  ;;  %v1258_v29 = vshrl.u32 %v1195_v16, 16  ;;  %v1262_v30 = vcombine.low %v1232_v17, %v1248_v21  ;;  %v2951_v20 = vld [vmem:[#allocation7 + $0x18] sm:$0xff]   ;;  %v2952_v21 = vld [vmem:[#allocation7 + $0x20] sm:$0xff]   ;;  %v2953_v22 = vld [vmem:[#allocation7 + $0x28] sm:$0xff]  }
 0x4cd   : > { %v1244_v31 = vpack.i.b16 %v1243_v19, %v1242_v26  ;;  %v1270_v32 = vcombine.low %v1240_v24, %v1256_v27  ;;  %v3001_v33 = vpop.eup %3000  ;;  %v2950_v19 = vld [vmem:[#allocation7 + $0x10] sm:$0xff]  }
 0x4ce   : > { %v1260_v34 = vpack.i.b16 %v1259_v28, %v1258_v29  ;;  %v1287_v35 = vcombine.low %v1236_v23, %v1252_v41  ;;  %v1269_v36 = vrot.slane %v1262_v30, %v3610_v7  ;;  %v1551_v37 = vsel %vm1523_vm3, %v3001_v33, 0.0 }
 0x4cf   : > { %v1277_v38 = vrot.slane %v1270_v32, %v3610_v7  ;;  %1552 = vadd.xlane.f32.xlu0 %v1551_v37  ;;  %v1561_v4 = vpack.c.bf16 %v3001_v33, %v3001_v33 }
 0x4d0   : > { %v1295_v39 = vcombine.low %v1244_v31, %v1260_v34  ;;  %v1294_v44 = vrot.slane %v1287_v35, %v3610_v7 }
 0x4d1   : > { %v1278_v40 = vcombine.low %v1269_v36, %v1277_v38 }
 0x4d2   : > { %v1302_v47 = vrot.slane %v1295_v39, %v3610_v7 }
 0x4d3   : > { %v1285_v49 = vrot.slane %v1278_v40, %v3613_v10 }
 0x4d4   : > { %v1303_v50 = vcombine.low %v1294_v44, %v1302_v47 }
 0x4d5   : > { %v1286_v51 = vcombine.high %v1285_v49, %v3251_v25  ;;  %v1315_v54 = vshrl.u32 %v1285_v49, 16 }
 0x4d6   : > { %v1310_v52 = vrot.slane %v1303_v50, %v3613_v10 }
 0x4d7   : > { %v1321_v57 = vshrl.u32 %v1286_v51, 16 }
 0x4d8   : > { %v1314_v53 = vpack.i.b16 %v1310_v52, %v1285_v49  ;;  %v1316_v55 = vshrl.u32 %v1310_v52, 16  ;;  %v1311_v56 = vcombine.high %v1310_v52, %v3251_v25 }
 0x4da   : > { %v1569_v58 = vsel %vm1567_vm4, %v1314_v53, 0  ;;  %v1317_v59 = vpack.i.b16 %v1316_v55, %v1315_v54  ;;  %v1320_v60 = vpack.i.b16 %v1311_v56, %v1286_v51  ;;  %v1322_v61 = vshrl.u32 %v1311_v56, 16 }
 0x4db   : > { %2771 = vmatpush3.bf16.msra.mxu0 %v1569_v58 }
 0x4dc   : > { %v1615_v62 = vsel %vm1567_vm4, %v1317_v59, 0  ;;  %2782 = vmatprep.subr.bf16.mxu0 %v3250_v3  ;;  %v1323_v1 = vpack.i.b16 %v1322_v61, %v1321_v57  ;;  %v1661_v2 = vsel %vm1567_vm4, %v1320_v60, 0 }
 0x4dd   : > { %2777 = vmatpush3.bf16.msra.mxu1 %v1615_v62 }
 0x4de   : > { %2773 = vmatmul.mubr.msk.bf16.vlgmr.msra.gmra.mrb[4].mxu0 %vm1523_vm3, %v1560_v0  ;;  %2788 = vmatprep.subr.bf16.mxu1 %v3250_v3  ;;  %v1707_v6 = vsel %vm1567_vm4, %v1323_v1, 0 }
 0x4df   : > { %2783 = vmatpush3.bf16.msra.mxu0 %v1661_v2  ;;  %2784 = vmatprep.mubr.msk.bf16.mxu0 %vm3252_vm0, %v3250_v3 }
 0x4e0   : > { %2779 = vmatmul.mubr.msk.bf16.vlgmr.msra.gmra.mrb[20].mxu1 %vm1523_vm3, %v1561_v4  ;;  %2794 = vmatprep.subr.bf16.mxu0 %v3250_v3 }
 0x4e1   : > { %2789 = vmatpush3.bf16.msra.mxu1 %v1707_v6  ;;  %2790 = vmatprep.mubr.msk.bf16.mxu1 %vm3252_vm0, %v3250_v3 }
 0x4eb   : > { %v1532_v5 = vpop.xlane.xlu1 %1531 }
 0x4ec   : > { %v1538_v8 = vsub.f32 %v3688_v45, %v1532_v5  ;;  %v2954_v5 = vld [vmem:[#allocation7 + $0x30] sm:$0xff]  }
 0x4ee   : > { %v1544_v9 = vmul.f32 1.442695, %v1538_v8 }
 0x4f0   : > { %3002 = vpow2.f32 %v1544_v9 }
 0x4f3   : > { %v1535_v11 = vpop.xlane.xlu0 %1534 }
 0x4f4   : > { %v1539_v12 = vsub.f32 %v3692_v48, %v1535_v11  ;;  %v2948_v48 = vld [vmem:[#allocation7] sm:$0xff]  }
 0x4f6   : > { %v1546_v13 = vmul.f32 1.442695, %v1539_v12 }
 0x4f8   : > { %3004 = vpow2.f32 %v1546_v13 }
 0x4fa   : > { %v3003_v14 = vpop.eup %3002 }
 0x4fb   : > { %v1554_v63 = vsel %vm1523_vm3, %v3003_v14, 0.0  ;;  %v1562_v15 = vpack.c.bf16 %v3003_v14, %v3003_v14 }
 0x4fc   : > { %1555 = vadd.xlane.f32.xlu1 %v1554_v63 }
 0x4fd   : > { %2785 = vmatmul.mubr.msk.bf16.vlgmr.msra.gmra.mrb[8].mxu0 %vm1523_vm3, %v1562_v15 }
 0x4fe   : > { %2810 = vmatprep.mubr.msk.bf16.mxu0 %vm3252_vm0, %v3250_v3  ;;  %2795 = vmatpush3.bf16.msra.mxu0 %v2948_v48 }
 0x4ff   : > { %2796 = vmatprep.subr.bf16.mxu0 %v3250_v3 }
 0x502   : > { %v3005_v16 = vpop.eup %3004  ;;  %2797 = vmatpush3.bf16.msra.mxu0 %v2949_v18  ;;  %v2955_v18 = vld [vmem:[#allocation7 + $0x38] sm:$0xff]  }
 0x503   : > { %v1557_v45 = vsel %vm1523_vm3, %v3005_v16, 0.0  ;;  %v1563_v17 = vpack.c.bf16 %v3005_v16, %v3005_v16  ;;  %2798 = vmatprep.subr.bf16.mxu0 %v3250_v3 }
 0x504   : > { %1558 = vadd.xlane.f32.xlu0 %v1557_v45 }
 0x505   : > { %2791 = vmatmul.mubr.msk.bf16.vlgmr.msra.gmra.mrb[24].mxu1 %vm1523_vm3, %v1563_v17 }
 0x506   : > { %2183 = vmatprep.mubr.bf16.mxu1 %v3251_v25  ;;  %2799 = vmatpush3.bf16.msra.mxu0 %v2950_v19 }
 0x507   : > { %2800 = vmatprep.subr.bf16.mxu0 %v3250_v3 }
 0x50a   : > { %2801 = vmatpush3.bf16.msra.mxu0 %v2951_v20 }
 0x50b   : > { %2802 = vmatprep.subr.bf16.mxu0 %v3250_v3 }
 0x50e   : > { %2803 = vmatpush3.bf16.msra.mxu0 %v2952_v21 }
 0x50f   : > { %2804 = vmatprep.subr.bf16.mxu0 %v3250_v3 }
 0x512   : > { %2805 = vmatpush3.bf16.msra.mxu0 %v2953_v22 }
 0x513   : > { %2806 = vmatprep.subr.bf16.mxu0 %v3250_v3 }
 0x516   : > { %2807 = vmatpush3.bf16.msra.mxu0 %v2954_v5 }
 0x517   : > { %2808 = vmatprep.subr.bf16.mxu0 %v3250_v3 }
 0x51a   : > { %2809 = vmatpush3.bf16.msra.mxu0 %v2955_v18  ;;  %v2985_v18 = vld [vmem:[#allocation10 + $0x10] sm:$0xff]  }
 0x554   : > { %v1550_v30 = vpop.xlane.xlu1 %1549 }
 0x555   : > { %3006 = vrcp.f32 %v1550_v30 }
 0x55c   : > { %v1553_v32 = vpop.xlane.xlu0 %1552 }
 0x55f   : > { %v3007_v34 = vpop.eup %3006 }
 0x589   : > { %v1556_v31 = vpop.xlane.xlu1 %1555 }
 0x58a   : > { %3008 = vrcp.f32 %v1556_v31 }
 0x58b   : > { %3010 = vrcp.f32 %v1553_v32 }
 0x591   : > { %v1559_v33 = vpop.xlane.xlu0 %1558 }
 0x592   : > { %3012 = vrcp.f32 %v1559_v33 }
 0x594   : > { %v3009_v35 = vpop.eup %3008 }
 0x595   : > { %v3011_v50 = vpop.eup %3010 }
 0x59c   : > { %v3013_v51 = vpop.eup %3012 }
 0x5b1   : > { %v1605_v25 = vpop.f32.mrb[4].mxu0 }
 0x5b2   : > { %v2774_v23 = vpop.f32.mrb[5].mxu0  ;;  %v1753_v37 = vmul.f32 %v3007_v34, %v1605_v25 }
 0x5b3   : > { %v1608_v24 = vpop.f32.mrb[6].mxu0  ;;  %v1651_v26 = vpop.f32.mrb[20].mxu1 }
 0x5b4   : > { %v2775_v27 = vpop.f32.mrb[7].mxu0  ;;  %v2780_v28 = vpop.f32.mrb[21].mxu1  ;;  %v1754_v53 = vmul.f32 %v3011_v50, %v1651_v26  ;;  %v2964_v50 = vld [vmem:[#allocation8 + $0x24] ss:$8 sps:$4 sm:$0xff]  }
 0x5b5   : > { %v1654_v41 = vpop.f32.mrb[22].mxu1 }
 0x5b6   : > { %v2781_v29 = vpop.f32.mrb[23].mxu1 }
 0x5d0   : > { %v1697_v36 = vpop.f32.mrb[8].mxu0 }
 0x5d1   : > { %v1755_v38 = vmul.f32 %v3009_v35, %v1697_v36  ;;  %v2786_v39 = vpop.f32.mrb[9].mxu0  ;;  %v3020_v35 = vld [vmem:[%s3548_s20] sm:$0xff]  ;;  %s2667_s20 = sshll.u32 %s3351_s14, 7  ;;  %s3259_s14 = smov [#allocation11]  }
 0x5d2   : > { %v1700_v40 = vpop.f32.mrb[10].mxu0  ;;  %s3167_s30 = sshll.u32 %s3259_s14, 4  ;;  %s3168_s30 = int_to_ptr.vmem [resolvable:$false] %s3167_s30 }
 0x5d3   : > { %v1757_v44 = vcombine.low %v1753_v37, %v1755_v38  ;;  %v1758_v47 = vcombine.high %v1753_v37, %v1755_v38  ;;  %v2787_v49 = vpop.f32.mrb[11].mxu0  ;;  %v2956_v40 = vld [vmem:[#allocation8] ss:$8 sps:$4 sm:$0xff]   ;;  %s3169_s24 = scalar_lea.vmem %s3168_s30, 256 }
 0x5d4   : > { %v2959_v49 = vld [vmem:[#allocation8 + $0x10] ss:$8 sps:$4 sm:$0xff]  }
 0x5d5   : > { %v1765_v60 = vrot.slane %v1757_v44, %v3610_v7  ;;  %v1772_v61 = vrot.slane %v1758_v47, %v3610_v7  ;;  %v2958_v44 = vld [vmem:[#allocation8 + $0x4] ss:$8 sps:$4 sm:$0xff]   ;;  %v2961_v47 = vld [vmem:[#allocation8 + $0x14] ss:$8 sps:$4 sm:$0xff]  }
 0x5d6   : > { %2151 = vmatprep.subr.bf16.mxu1 %v2958_v44 }
 0x5d7   : > { %2152 = vmatpush1.bf16.msra.mxu1 %v2956_v40 }
 0x5d8   : > { %v1743_v52 = vpop.f32.mrb[24].mxu1  ;;  %2153 = vmatprep.subr.bf16.mxu1 %v2961_v47 }
 0x5d9   : > { %v1756_v54 = vmul.f32 %v3013_v51, %v1743_v52  ;;  %v2792_v55 = vpop.f32.mrb[25].mxu1  ;;  %v2962_v51 = vld [vmem:[#allocation8 + $0x20] ss:$8 sps:$4 sm:$0xff]  }
 0x5da   : > { %v1746_v56 = vpop.f32.mrb[26].mxu1 }
 0x5db   : > { %v1773_v57 = vcombine.low %v1754_v53, %v1756_v54  ;;  %v1774_v58 = vcombine.high %v1754_v53, %v1756_v54  ;;  %v2793_v59 = vpop.f32.mrb[27].mxu1  ;;  %2154 = vmatpush1.bf16.msra.mxu1 %v2959_v49  ;;  %v2967_v56 = vld [vmem:[#allocation8 + $0x34] ss:$8 sps:$4 sm:$0xff]  }
 0x5dc   : > { %2155 = vmatprep.subr.bf16.mxu1 %v2964_v50  ;;  %v2968_v59 = vld [vmem:[#allocation8 + $0x40] ss:$8 sps:$4 sm:$0xff]  }
 0x5dd   : > { %v1781_v62 = vrot.slane %v1773_v57, %v3610_v7  ;;  %v1788_v0 = vrot.slane %v1774_v58, %v3610_v7  ;;  %v2965_v57 = vld [vmem:[#allocation8 + $0x30] ss:$8 sps:$4 sm:$0xff]   ;;  %v2970_v58 = vld [vmem:[#allocation8 + $0x44] ss:$8 sps:$4 sm:$0xff]  }
 0x5df   : > { %v1789_v1 = vcombine.low %v1765_v60, %v1781_v62  ;;  %v1790_v2 = vcombine.high %v1765_v60, %v1781_v62  ;;  %v1805_v4 = vcombine.low %v1772_v61, %v1788_v0  ;;  %v1806_v6 = vcombine.high %v1772_v61, %v1788_v0  ;;  %2156 = vmatpush1.bf16.msra.mxu1 %v2962_v51  ;;  %v2973_v60 = vld [vmem:[#allocation8 + $0x54] ss:$8 sps:$4 sm:$0xff]   ;;  %v2971_v61 = vld [vmem:[#allocation8 + $0x50] ss:$8 sps:$4 sm:$0xff]   ;;  %v2974_v62 = vld [vmem:[#allocation8 + $0x60] ss:$8 sps:$4 sm:$0xff]  }
 0x5e0   : > { %2157 = vmatprep.subr.bf16.mxu1 %v2967_v56  ;;  %v2976_v0 = vld [vmem:[#allocation8 + $0x64] ss:$8 sps:$4 sm:$0xff]  }
 0x5e1   : > { %v1797_v8 = vrot.slane %v1789_v1, %v3613_v10  ;;  %v1804_v9 = vrot.slane %v1790_v2, %v3613_v10  ;;  %v1813_v11 = vrot.slane %v1805_v4, %v3613_v10  ;;  %v1820_v12 = vrot.slane %v1806_v6, %v3613_v10  ;;  %v2979_v1 = vld [vmem:[#allocation8 + $0x74] ss:$8 sps:$4 sm:$0xff]   ;;  %v2977_v2 = vld [vmem:[#allocation8 + $0x70] ss:$8 sps:$4 sm:$0xff]  }
 0x5e3   : > { %v1825_v13 = vcombine.low %v1797_v8, %v1804_v9  ;;  %v2619_v14 = vcombine.high %v1797_v8, %v1804_v9  ;;  %v1841_v63 = vcombine.low %v1813_v11, %v1820_v12  ;;  %v2620_v15 = vcombine.high %v1813_v11, %v1820_v12  ;;  %2158 = vmatpush1.bf16.msra.mxu1 %v2965_v57  ;;  %v2629_v9 = vld [vmem:[%s3887_s16] ss:$0 sm:$0xff]  ;;  %s2451_s16 = sshll.u32 %s524_s7, 4  ;;  %s3806_s16 = int_to_ptr.vmem [resolvable:$true] %s2451_s16 }
 0x5e4   : > { %2159 = vmatprep.subr.bf16.mxu1 %v2970_v58  ;;  %p3170_p1 = scmp.lt.s32.totalorder %s3806_s16, %s3168_s30 }
 0x5e5   : > { %v1832_v16 = vrot.slane %v1825_v13, %v3610_v7  ;;  %v1840_v45 = vrot.slane %v2619_v14, %v3610_v7  ;;  %v1848_v17 = vrot.slane %v1841_v63, %v3610_v7  ;;  %v1856_v48 = vrot.slane %v2620_v15, %v3610_v7  ;;  %v2980_v15 = vld [vmem:[#allocation10 + $0x40] sm:$0xff]  }
 0x5e6   : > { %2704 = vmatprep.subr.bf16.mxu0 %v2980_v15 }
 0x5e7   : > { %v1858_v19 = vcombine.high %v1832_v16, %v1840_v45  ;;  %v1874_v20 = vcombine.high %v1848_v17, %v1856_v48  ;;  %v1857_v21 = vcombine.low %v1832_v16, %v1840_v45  ;;  %v1873_v22 = vcombine.low %v1848_v17, %v1856_v48  ;;  %2160 = vmatpush1.bf16.msra.mxu1 %v2968_v59  ;;  %v2981_v16 = vld [vmem:[#allocation10] sm:$0xff]   ;;  %v2982_v45 = vld [vmem:[#allocation10 + $0x48] sm:$0xff]   ;;  %v2984_v48 = vld [vmem:[#allocation10 + $0x50] sm:$0xff]  }
 0x5e8   : > { %2161 = vmatprep.subr.bf16.mxu1 %v2973_v60  ;;  %v2983_v17 = vld [vmem:[#allocation10 + $0x8] sm:$0xff]  }
 0x5e9   : > { %v1872_v25 = vrot.slane %v1858_v19, %v3613_v10  ;;  %v1888_v23 = vrot.slane %v1874_v20, %v3613_v10  ;;  %v1865_v3 = vrot.slane %v1857_v21, %v3613_v10  ;;  %v1881_v24 = vrot.slane %v1873_v22, %v3613_v10  ;;  %v2986_v19 = vld [vmem:[#allocation10 + $0x58] sm:$0xff]   ;;  %v2988_v21 = vld [vmem:[#allocation10 + $0x60] sm:$0xff]  }
 0x5ea   : > { %v2987_v20 = vld [vmem:[#allocation10 + $0x18] sm:$0xff]   ;;  %v2989_v22 = vld [vmem:[#allocation10 + $0x20] sm:$0xff]  }
 0x5eb   : > { %v1891_v26 = vcombine.low %v1872_v25, %v1888_v23  ;;  %v1890_v27 = vcombine.high %v1865_v3, %v1881_v24  ;;  %v1892_v28 = vcombine.high %v1872_v25, %v1888_v23  ;;  %v1889_v41 = vcombine.low %v1865_v3, %v1881_v24  ;;  %2162 = vmatpush1.bf16.msra.mxu1 %v2971_v61  ;;  %v2990_v25 = vld [vmem:[#allocation10 + $0x68] sm:$0xff]   ;;  %v2992_v3 = vld [vmem:[#allocation10 + $0x70] sm:$0xff]  }
 0x5ec   : > { %2163 = vmatprep.subr.bf16.mxu1 %v2976_v0  ;;  %v2991_v23 = vld [vmem:[#allocation10 + $0x28] sm:$0xff]   ;;  %v2993_v24 = vld [vmem:[#allocation10 + $0x30] sm:$0xff]  }
 0x5ed   : > { %1898 = vrot.lane.b32.xlu0 %v1891_v26, %s3255_s19  ;;  %1894 = vrot.lane.b32.xlu1 %v1890_v27, %s3253_s8  ;;  %s3888_s8 = sld [smem:[#allocation18_spill]]  ;;  %v2994_v26 = vld [vmem:[#allocation10 + $0x78] sm:$0xff]   ;;  %s2438_s19 = scalar_lea.sflag [#allocation4], %s3542_s4 }
 0x5ee   : > { %v2995_v27 = vld [vmem:[#allocation10 + $0x38] sm:$0xff]  }
 0x5ef   : > { %2164 = vmatpush1.bf16.msra.mxu1 %v2974_v62 }
 0x5f0   : > { %2165 = vmatprep.subr.bf16.mxu1 %v2979_v1 }
 0x5f1   : > { %1902 = vrot.lane.b32.xlu1 %v1892_v28, %s3254_s10  ;;  %v2059_v28 = vld [vmem:[%s3889_s21] sm:$0x3]  ;;  %s3163_s21 = scalar_lea.vmem %s3806_s16, 128 }
 0x5f2   : > { %p3164_p0 = scmp.ne.s32.totalorder %s3806_s16, %s3163_s21  ;;  %p3171_p11 = scmp.lt.s32.totalorder %s3169_s24, %s3163_s21 }
 0x5f3   : > { %2166 = vmatpush1.bf16.msra.mxu1 %v2977_v2  ;;  %v2630_v12 = vld [vmem:[%s3888_s8] ss:$0 sm:$0xff]  ;;  %s3891_s8 = sld [smem:[#allocation21_spill]] }
 0x5f4   : > { %p3165_p5 = pnand %p3164_p0, %p3892_p2  ;;  %p3172_p12 = por %p3171_p11, %p3170_p1 }
 0x5f6   : > { %p3166_p10 = pneg %p3165_p5 }
 0x5f8   : > { %p3173_p13 = pnand %p3172_p12, %p3166_p10 }
 0x5f9   : > { %s3804_s10 = scalar_lea.hbm %s3891_s8, %s2667_s20 }
 0x65f   : > { %v1895_v7 = vpop.permute.xlu1 %1894  ;;  %v1899_v29 = vpop.permute.xlu0 %1898 }
 0x660   : > { %v1905_v30 = vsel %vm1338_vm1, %v1889_v41, %v1895_v7  ;;  %v2064_v41 = vrot.slane %v2059_v28, %v595_v46  ;;  %v2068_v7 = vrot.slane %v2059_v28, %v599_v43 }
 0x661   : > { %v1907_v32 = vsel %vm1906_vm5, %v1905_v30, %v1899_v29 }
 0x663   : > { %v1903_v31 = vpop.permute.xlu1 %1902 }
 0x664   : > { %v1909_v10 = vsel %vm1908_vm6, %v1907_v32, %v1903_v31 }
 0x665   : > { %v1910_v33 = vpack.c.bf16 %v1909_v10, %v1909_v10 }
 0x667   : > { %2811 = vmatmul.mubr.bf16.vlgmr.msra.gmra.mrb[12].mxu0 %v1910_v33 }
 0x668   : > { %2705 = vmatpush3.bf16.msra.mxu0 %v2981_v16 }
 0x669   : > { %2706 = vmatprep.subr.bf16.mxu0 %v2982_v45 }
 0x66c   : > { %2707 = vmatpush3.bf16.msra.mxu0 %v2983_v17 }
 0x66d   : > { %2708 = vmatprep.subr.bf16.mxu0 %v2984_v48 }
 0x670   : > { %2709 = vmatpush3.bf16.msra.mxu0 %v2985_v18 }
 0x671   : > { %2710 = vmatprep.subr.bf16.mxu0 %v2986_v19 }
 0x674   : > { %2711 = vmatpush3.bf16.msra.mxu0 %v2987_v20 }
 0x675   : > { %2712 = vmatprep.subr.bf16.mxu0 %v2988_v21 }
 0x678   : > { %2713 = vmatpush3.bf16.msra.mxu0 %v2989_v22 }
 0x679   : > { %2714 = vmatprep.subr.bf16.mxu0 %v2990_v25 }
 0x67c   : > { %2715 = vmatpush3.bf16.msra.mxu0 %v2991_v23 }
 0x67d   : > { %2716 = vmatprep.subr.bf16.mxu0 %v2992_v3 }
 0x680   : > { %2717 = vmatpush3.bf16.msra.mxu0 %v2993_v24 }
 0x681   : > { %2718 = vmatprep.subr.bf16.mxu0 %v2994_v26 }
 0x684   : > { %2719 = vmatpush3.bf16.msra.mxu0 %v2995_v27 }
 0x73a   : > { %v2009_v34 = vpop.f32.mrb[12].mxu0 }
 0x73b   : > { %v2010_v36 = vadd.f32 %v3020_v35, %v2009_v34  ;;  %v2812_v37 = vpop.f32.mrb[13].mxu0 }
 0x73c   : > { %v2012_v38 = vpop.f32.mrb[14].mxu0 }
 0x73d   : > { %2017 = vadd.xlane.f32.xlu1 %v2010_v36  ;;  %v2813_v39 = vpop.f32.mrb[15].mxu0 }
 0x7ca   : > { %v2018_v52 = vpop.xlane.xlu1 %2017 }
 0x7cb   : > { %v2019_v53 = vmul.f32 0.0078125, %v2018_v52 }
 0x7cd   : > { %v2020_v54 = vsub.f32 %v2010_v36, %v2019_v53 }
 0x7cf   : > { %v2021_v55 = vmul.f32 %v2020_v54, %v2020_v54 }
 0x7d1   : > { %2022 = vadd.xlane.f32.xlu0 %v2021_v55 }
 0x85e   : > { %v2023_v4 = vpop.xlane.xlu0 %2022 }
 0x85f   : > { %v2024_v6 = vmul.f32 0.0078125, %v2023_v4 }
 0x861   : > { %v2025_v5 = vadd.f32 1e-05, %v2024_v6 }
 0x863   : > { %3014 = vrsqrt.f32 %v2025_v5 }
 0x86d   : > { %v3015_v8 = vpop.eup %3014 }
 0x86e   : > { %v2027_v11 = vmul.f32 %v3015_v8, %v2020_v54 }
 0x870   : > { %v2034_v13 = vmul.f32 %v2629_v9, %v2027_v11 }
 0x872   : > { %v3775_v14 = vadd.f32 %v2630_v12, %v2034_v13 }
 0x874   : > { %v2042_v63 = vpack.c.bf16 %v3775_v14, %v3775_v14 }
 0x876   : > { %2184 = vmatmul.mubr.bf16.vlgmr.msra.gmra.mrb[28].mxu1 %v2042_v63 }
 0x949   : > { %v2185_v29 = vpop.f32.mrb[28].mxu1 }
 0x94a   : > { %v3786_v30 = vadd.f32 %v2185_v29, %v2064_v41  ;;  %v2187_v31 = vpop.f32.mrb[29].mxu1 }
 0x94b   : > { %v3788_v32 = vadd.f32 %v2187_v31, %v2068_v7  ;;  %v2189_v10 = vpop.f32.mrb[30].mxu1 }
 0x94c   : > { %v2194_v33 = vmul.f32 0.70710677, %v3786_v30  ;;  %v2190_v34 = vpop.f32.mrb[31].mxu1  ;;  %v2192_v31 = vmul.f32 0.5, %v3786_v30 }
 0x94d   : > { %v2195_v35 = vmul.f32 0.70710677, %v3788_v32 }
 0x94e   : > { %v2647_v36 = vclamps-f32 %v2194_v33, 4.0  ;;  %v2193_v33 = vmul.f32 0.5, %v3788_v32 }
 0x94f   : > { %v2648_v37 = vclamps-f32 %v2195_v35, 4.0 }
 0x950   : > { %v2200_v38 = vmul.f32 %v2647_v36, %v2647_v36 }
 0x951   : > { %v2201_v39 = vmul.f32 %v2648_v37, %v2648_v37 }
 0x952   : > { %v2202_v46 = vmul.f32 -2.7261424e-10, %v2200_v38  ;;  %v2228_v40 = vmul.f32 -1.45660715e-05, %v2200_v38 }
 0x953   : > { %v2203_v42 = vmul.f32 -2.7261424e-10, %v2201_v39  ;;  %v2229_v43 = vmul.f32 -1.45660715e-05, %v2201_v39 }
 0x954   : > { %v2204_v44 = vadd.f32 2.7706815e-08, %v2202_v46  ;;  %v2230_v47 = vadd.f32 -0.00021337405, %v2228_v40 }
 0x955   : > { %v2205_v49 = vadd.f32 2.7706815e-08, %v2203_v42  ;;  %v2231_v50 = vadd.f32 -0.00021337405, %v2229_v43 }
 0x956   : > { %v2206_v51 = vmul.f32 %v2204_v44, %v2200_v38  ;;  %v2232_v52 = vmul.f32 %v2230_v47, %v2200_v38 }
 0x957   : > { %v2207_v53 = vmul.f32 %v2205_v49, %v2201_v39  ;;  %v2233_v54 = vmul.f32 %v2231_v50, %v2201_v39 }
 0x958   : > { %v2208_v55 = vadd.f32 -2.101024e-06, %v2206_v51  ;;  %v2234_v56 = vadd.f32 -0.001682827, %v2232_v52 }
 0x959   : > { %v2209_v57 = vadd.f32 -2.101024e-06, %v2207_v53  ;;  %v2235_v58 = vadd.f32 -0.001682827, %v2233_v54 }
 0x95a   : > { %v2210_v59 = vmul.f32 %v2208_v55, %v2200_v38  ;;  %v2236_v60 = vmul.f32 %v2234_v56, %v2200_v38 }
 0x95b   : > { %v2211_v61 = vmul.f32 %v2209_v57, %v2201_v39  ;;  %v2237_v62 = vmul.f32 %v2235_v58, %v2201_v39 }
 0x95c   : > { %v2212_v0 = vadd.f32 -5.6925062e-05, %v2210_v59  ;;  %v2238_v1 = vadd.f32 -0.0073733293, %v2236_v60 }
 0x95d   : > { %v2213_v2 = vadd.f32 -5.6925062e-05, %v2211_v61  ;;  %v2239_v4 = vadd.f32 -0.0073733293, %v2237_v62 }
 0x95e   : > { %v2214_v6 = vmul.f32 %v2212_v0, %v2200_v38  ;;  %v2240_v5 = vmul.f32 %v2238_v1, %v2200_v38 }
 0x95f   : > { %v2215_v8 = vmul.f32 %v2213_v2, %v2201_v39  ;;  %v2241_v9 = vmul.f32 %v2239_v4, %v2201_v39 }
 0x960   : > { %v2216_v11 = vadd.f32 -0.00073499064, %v2214_v6  ;;  %v2242_v12 = vadd.f32 -0.014264739, %v2240_v5 }
 0x961   : > { %v2217_v13 = vadd.f32 -0.00073499064, %v2215_v8  ;;  %v2243_v63 = vadd.f32 -0.014264739, %v2241_v9 }
 0x962   : > { %v2218_v15 = vmul.f32 %v2216_v11, %v2200_v38  ;;  %3016 = vrcp.f32 %v2242_v12 }
 0x963   : > { %v2219_v16 = vmul.f32 %v2217_v13, %v2201_v39  ;;  %3018 = vrcp.f32 %v2243_v63 }
 0x964   : > { %v2220_v45 = vadd.f32 -0.0029546, %v2218_v15 }
 0x965   : > { %v2221_v17 = vadd.f32 -0.0029546, %v2219_v16 }
 0x966   : > { %v2222_v48 = vmul.f32 %v2220_v45, %v2200_v38 }
 0x967   : > { %v2223_v18 = vmul.f32 %v2221_v17, %v2201_v39 }
 0x968   : > { %v2224_v21 = vadd.f32 -0.016096033, %v2222_v48 }
 0x969   : > { %v2225_v25 = vadd.f32 -0.016096033, %v2223_v18 }
 0x96a   : > { %v2226_v26 = vmul.f32 %v2647_v36, %v2224_v21 }
 0x96b   : > { %v2227_v28 = vmul.f32 %v2648_v37, %v2225_v25  ;;  %v2649_v37 = vld [vmem:[%s3890_s17] ss:$0 sm:$0xff] }
 0x96c   : > { %v3017_v19 = vpop.eup %3016 }
 0x96d   : > { %v3019_v20 = vpop.eup %3018  ;;  %v2246_v22 = vmul.f32 %v3017_v19, %v2242_v12 }
 0x96e   : > { %v2247_v23 = vmul.f32 %v3019_v20, %v2243_v63 }
 0x96f   : > { %v2248_v3 = vsub.f32 2.0, %v2246_v22 }
 0x970   : > { %v2249_v24 = vsub.f32 2.0, %v2247_v23 }
 0x971   : > { %v2250_v27 = vmul.f32 %v3017_v19, %v2248_v3 }
 0x972   : > { %v2251_v41 = vmul.f32 %v3019_v20, %v2249_v24 }
 0x973   : > { %v2252_v7 = vmul.f32 %v2250_v27, %v2226_v26 }
 0x974   : > { %v2253_v29 = vmul.f32 %v2251_v41, %v2227_v28 }
 0x975   : > { %v2254_v10 = vadd.f32 1.0, %v2252_v7 }
 0x976   : > { %v2255_v34 = vadd.f32 1.0, %v2253_v29 }
 0x977   : > { %v2256_v35 = vmul.f32 %v2254_v10, %v2192_v31 }
 0x978   : > { %v2257_v38 = vmul.f32 %v2255_v34, %v2193_v33 }
 0x979   : > { %v2258_v46 = vpack.c.bf16 %v2256_v35, %v2256_v35 }
 0x97a   : > { %v2259_v39 = vpack.c.bf16 %v2257_v38, %v2257_v38 }
 0x97c   : > { %2427 = vmatprep.mubr.bf16.mxu0 %v2259_v39 }
 0x97d   : > { %2428 = vmatmul.mubr.bf16.vlgmr.msra.gmra.mrb[16].mxu0 %v2258_v46 }
 0xa50   : > { %v2720_v36 = vpop.f32.mrb[16].mxu0 }
 0xa51   : > { %v2721_v30 = vpop.f32.mrb[17].mxu0 }
 0xa52   : > { %v2722_v40 = vadd.f32 %v2721_v30, %v2720_v36  ;;  %v2723_v42 = vpop.f32.mrb[18].mxu0 }
 0xa53   : > { %v2724_v43 = vpop.f32.mrb[19].mxu0 }
 0xa54   : > { %v2430_v32 = vadd.f32 %v2722_v40, %v2649_v37 }
 0xa56   : > { %v2435_v44 = vadd.f32 %v2430_v32, %v3775_v14 }
 0xa58   : > { %2436 = vst [vmem:[%s524_s7] sm:$0xff] %v2435_v44 }
 0xa59   : > { %3176 = shalt.err (!%p3173_p13)
}
 0xa5a   : > { %s3177_s4 = scalar_lea.hbm %s3804_s10, 128  ;;  %s3181_s20 = scalar_lea.hbm %s3891_s8, 256 }
 0xa5b   : > { %p3178_p3 = scmp.ne.s32.totalorder %s3804_s10, %s3177_s4  ;;  %p3182_p4 = scmp.lt.u32.totalorder %s3804_s10, %s3891_s8 }
 0xa5c   : > { %p3183_p8 = scmp.lt.u32.totalorder %s3181_s20, %s3177_s4  ;;  %p3185_p0 = scmp.lt.u32.totalorder %s3177_s4, %s3804_s10 }
 0xa5d   : > { %p3179_p7 = pnand %p3178_p3, %p3892_p2 }
 0xa5e   : > { %p3184_p6 = por %p3183_p8, %p3182_p4 }
 0xa5f   : > { %p3180_p9 = pneg %p3179_p7 }
 0xa60   : > { %p3186_p5 = por %p3185_p0, %p3184_p6 }
 0xa62   : > { %p3187_p10 = pnand %p3186_p5, %p3180_p9 }
 0xa64   : > { %3190 = shalt.err (!%p3187_p10)
}
 0xa65   : > { %2832 = dma.vmem_to_hbm [thread:$0]  (%p3892_p2), %s3806_s16, 128, %s3804_s10, %s2438_s19  }
 0xa66 PF: > { %s2463_s13 = sand.u32 1, %s3225_s25   ;;  %p3893_p1 = scmp.ne.s32.totalorder %s3880_s29, 0 }
 0xa67   : > { %p3894_p11 = scmp.ge.s32.totalorder %s3237_s28, 2  ;;  %s2464_s21 = scalar_lea.sflag [#allocation4], %s2463_s13 }
 0xa69   : > { %p2852_p12 = pnand %p3894_p11, %p3893_p1 }
 0xa6b   : > { %3220 = dma.done.wait (!%p2852_p12), %s2464_s21, 128  }
 0xa6c   : > { %3222 = vsyncadd (!%p2852_p12), %s2464_s21, 4294967168  ;;  %p28_p13 = scmp.ge.s32.totalorder %s3466_s18, 4   ;;  %s3895_s25 = smov %s3229_s26 }
 0xa6d   : > { %s3896_s26 = smov %s3233_s27  ;;  %s3897_s27 = smov %s3477_s23 }
 0xa6e   : > { %s3898_s28 = smov %s3466_s18  ;;  %30 = sbr.rel (!%p28_p13) target bundleno = 14 (0xe), region = 136 }
 0xa75   :  { %2469 = vsyncpa [#allocation3], 1 }
 0xa76   :  { %2471 = vsyncpa [#allocation3 + $0x1], 1 }
 0xa77   :  { %2472 = vsyncpa [#allocation6], 1 }
 0xa78   :  { %2473 = vsyncpa [#allocation9], 1 }
 0xa79   :  { %2474 = vsyncpa [#allocation4], 1 }
 0xa7a   :  { %2476 = vsyncpa [#allocation4 + $0x1], 1 }

</bundles_post_ra>
